<compile_context>
chip_gen: v7x
topology: tpu7x:2x2x1
jax: 0.10.0
libtpu: 0.0.40
codegen_flags: <defaults>
</compile_context>

<pallas_src>
import numpy as np
import jax
import jax.numpy as jnp
from jax.experimental import pallas as pl
from jax.experimental.pallas import tpu as pltpu


# ------------------------------ Pallas kernel -------------------------------

def _make_kernel(width):
    """Kernel closure over the static spatial width (needed for tap offsets)."""

    def kernel(x_ref, m_ref,
               w1_ref, b1_ref, w2_ref, b2_ref, w3_ref, b3_ref,
               fcw_ref, fcb_ref, o_ref):
        # x_ref  : (1, HW, C0p) f32   one sample, NHWC-flattened, channel-padded
        # m_ref  : (9, HW, 1)   f32   per-tap boundary masks (0/1)
        # w*_ref : (9*Cin, Cout) bf16 fused conv weights (1x1 folded in tap 4)
        # b*_ref : (1, Cout)    f32   summed conv biases
        # fcw_ref: (HW, C3)     f32   fc weight permuted to NHWC flatten order
        # fcb_ref: (1, 1)       f32
        # o_ref  : (1, 1, 1)    f32
        hw = x_ref.shape[1]
        masks = m_ref[...]                                  # (9, HW, 1) f32

        def res_block(y, w_ref, b_ref):
            # y: (HW, Cin) f32 -> (HW, Cout) f32
            cols = []
            for t in range(9):                              # static unroll
                dh, dw = t // 3 - 1, t % 3 - 1
                off = dh * width + dw                       # row offset of tap
                if off == 0:
                    col = y                                 # centre tap: no shift
                else:
                    # out[r] = y[(r + off) % HW]  (wrap killed by the mask)
                    col = pltpu.roll(y, (-off) % hw, axis=0) * masks[t]
                cols.append(col)
            patch = jnp.concatenate(cols, axis=1)           # (HW, 9*Cin) f32
            acc = jnp.dot(patch.astype(jnp.bfloat16), w_ref[...],
                          preferred_element_type=jnp.float32)
            return jnp.maximum(acc + b_ref[...], 0.0)       # f32

        y = res_block(x_ref[0], w1_ref, b1_ref)
        y = res_block(y, w2_ref, b2_ref)
        y = res_block(y, w3_ref, b3_ref)

        # Linear over the per-sample flatten (fc weight pre-permuted to NHWC):
        # out = sum_{p,c} y[p, c] * fcw[p, c] + fcb
        prod = y * fcw_ref[...]                             # (HW, C3) f32 (VPU)
        per_pixel = jnp.sum(prod, axis=1, keepdims=True)    # (HW, 1)   (XLU)
        total = jnp.sum(per_pixel, axis=0, keepdims=True)   # (1, 1)
        o_ref[0] = (total + fcb_ref[...]).astype(o_ref.dtype)

    return kernel


def _full_spec(shape):
    nd = len(shape)
    return pl.BlockSpec(shape, lambda n, _nd=nd: (0,) * _nd)


# ------------------------------ forward wrapper ------------------------------

@jax.jit
def rdiscriminator_forward(x_nchw, prep):
    N, C, H, W = x_nchw.shape
    HW = H * W
    c0p = prep["blocks"][0]["w"].shape[0] // 9          # padded Cin of block 1

    # NCHW -> per-sample NHWC flatten; zero-pad channels to the aligned width.
    x = jnp.transpose(x_nchw, (0, 2, 3, 1)).reshape(N, HW, C)
    x = jnp.pad(x, ((0, 0), (0, 0), (0, c0p - C))).astype(jnp.float32)

    operands = (x, prep["masks"],
                prep["blocks"][0]["w"], prep["blocks"][0]["b"],
                prep["blocks"][1]["w"], prep["blocks"][1]["b"],
                prep["blocks"][2]["w"], prep["blocks"][2]["b"],
                prep["fc_w"], prep["fc_b"])

    # Advisory cost estimate (real conv + fc work only; rolls/masks are VPU/XLU).
    flops = 0
    for blk in prep["blocks"]:
        k, cout = blk["w"].shape
        flops += 2 * HW * k * cout
    flops += 2 * HW * prep["fc_w"].shape[1]
    flops *= N
    bytes_accessed = sum(int(np.prod(a.shape)) * a.dtype.itemsize
                         for a in operands) + N * 4

    in_specs = [pl.BlockSpec((1, HW, c0p), lambda n: (n, 0, 0))] + \
               [_full_spec(a.shape) for a in operands[1:]]

    out = pl.pallas_call(
        _make_kernel(W),
        grid=(N,),
        in_specs=in_specs,
        out_specs=pl.BlockSpec((1, 1, 1), lambda n: (n, 0, 0)),
        out_shape=jax.ShapeDtypeStruct((N, 1, 1), jnp.float32),
        compiler_params=pltpu.CompilerParams(
            dimension_semantics=("parallel",)),
        cost_estimate=pl.CostEstimate(flops=flops, transcendentals=0,
                                      bytes_accessed=bytes_accessed),
    )(*operands)
    return out.reshape(N, 1)


# --------------------------- parameters & prep -------------------------------

def init_raw_params(key, in_channels=5, hidden_channels=1024):
    """Synthetic params in PyTorch layouts with PyTorch-default-like init."""
    chans = [(in_channels, 32), (32, 32), (32, 16)]
    blocks = []
    for i, (cin, cout) in enumerate(chans):
        k3, kb3, k1, kb1 = jax.random.split(jax.random.fold_in(key, i), 4)
        s3 = 1.0 / (9.0 * cin) ** 0.5
        s1 = 1.0 / float(cin) ** 0.5
        blocks.append(dict(
            w3=jax.random.uniform(k3, (cout, cin, 3, 3), jnp.float32, -s3, s3),
            b3=jax.random.uniform(kb3, (cout,), jnp.float32, -s3, s3),
            w1=jax.random.uniform(k1, (cout, cin, 1, 1), jnp.float32, -s1, s1),
            b1=jax.random.uniform(kb1, (cout,), jnp.float32, -s1, s1)))
    kf, kfb = jax.random.split(jax.random.fold_in(key, 99))
    sf = 1.0 / float(hidden_channels) ** 0.5
    return dict(blocks=blocks,
                fc_w=jax.random.uniform(kf, (1, hidden_channels),
                                        jnp.float32, -sf, sf),
                fc_b=jax.random.uniform(kfb, (1,), jnp.float32, -sf, sf))


def _boundary_masks(height, width):
    """masks[t, h*W+w, 0] = 1 iff the (kh,kw)=divmod(t,3) neighbour of pixel
    (h, w) lies inside the image (3x3 conv, pad=1)."""
    hw = height * width
    m = np.zeros((9, hw, 1), np.float32)
    for t in range(9):
        dh, dw = t // 3 - 1, t % 3 - 1
        for h in range(height):
            for w in range(width):
                if 0 <= h + dh < height and 0 <= w + dw < width:
                    m[t, h * width + w, 0] = 1.0
    return m


def prepare_params(raw, *, height, width, cin_align=16):
    """Fold 1x1 conv into the 3x3 centre tap, fuse the 9 taps into one
    (9*Cin, Cout) matmul operand, permute the fc weight to NHWC flatten order,
    and build the constant boundary masks."""
    blocks = []
    for blk in raw["blocks"]:
        cout, cin = blk["w3"].shape[:2]
        # taps[t] = w3[:, :, kh, kw].T -> (Cin, Cout), t = kh*3 + kw
        taps = jnp.stack([blk["w3"][:, :, kh, kw].T
                          for kh in range(3) for kw in range(3)], axis=0)
        taps = taps.at[4].add(blk["w1"][:, :, 0, 0].T)      # fold 1x1 (exact)
        cinp = ((cin + cin_align - 1) // cin_align) * cin_align
        if cinp != cin:                                      # K-align for bf16
            taps = jnp.pad(taps, ((0, 0), (0, cinp - cin), (0, 0)))
        blocks.append(dict(
            w=taps.reshape(9 * cinp, cout).astype(jnp.bfloat16),
            b=(blk["b3"] + blk["b1"]).reshape(1, cout).astype(jnp.float32)))

    c_last = raw["blocks"][-1]["w3"].shape[0]
    hw = height * width
    # fc rows come in PyTorch NCHW-flatten order (c*HW + p); permute to (p, c)
    # so the fc consumes the NHWC per-sample activation in place.
    wfc = raw["fc_w"][0].reshape(c_last, hw).T               # (HW, C3)
    return dict(
        blocks=blocks,
        fc_w=wfc.astype(jnp.float32),
        fc_b=raw["fc_b"].reshape(1, 1).astype(jnp.float32),
        masks=jnp.asarray(_boundary_masks(height, width)))


# ------------------------------ XLA reference --------------------------------

def reference_forward(x_nchw, raw):
    """Pure-JAX reference of the assumed PyTorch module (f32, unfused params)."""
    x = x_nchw
    dn = ("NCHW", "OIHW", "NCHW")
    for blk in raw["blocks"]:
        y3 = jax.lax.conv_general_dilated(x, blk["w3"], (1, 1),
                                          ((1, 1), (1, 1)),
                                          dimension_numbers=dn)
        y1 = jax.lax.conv_general_dilated(x, blk["w1"], (1, 1),
                                          ((0, 0), (0, 0)),
                                          dimension_numbers=dn)
        x = jnp.maximum(y3 + blk["b3"][None, :, None, None]
                        + y1 + blk["b1"][None, :, None, None], 0.0)
    flat = x.reshape(x.shape[0], -1)                         # PyTorch NCHW flatten
    return flat @ raw["fc_w"].T + raw["fc_b"]


# ----------------------------------- main -------------------------------------

if __name__ == "__main__":
    key = jax.random.PRNGKey(0)
    kx, kp = jax.random.split(key)

    # hidden_channels=1024 with 16 final channels => 8x8 spatial input.
    N, C, H, W = 2, 5, 8, 8
    x = jax.random.normal(kx, (N, C, H, W), jnp.float32)

    raw = init_raw_params(kp, in_channels=C, hidden_channels=16 * H * W)
    prep = prepare_params(raw, height=H, width=W)

    out = jax.block_until_ready(rdiscriminator_forward(x, prep))
    assert out.shape == (N, 1), out.shape

    # Cross-check the fused kernel against the f32 XLA reference.
    ref = jax.block_until_ready(reference_forward(x, raw))
    assert jnp.allclose(out, ref, atol=5e-2, rtol=5e-2), (out, ref)

    print("KERNEL_OK")
</pallas_src>

<mosaic_0001>
module attributes {stable_mosaic.version = 11 : i64} {
  func.func @kernel(%arg0: i32, %arg1: memref<1x64x16xf32, #tpu.memory_space<vmem>>, %arg2: memref<9x64x1xf32, #tpu.memory_space<vmem>>, %arg3: memref<144x32xbf16, #tpu.memory_space<vmem>>, %arg4: memref<1x32xf32, #tpu.memory_space<vmem>>, %arg5: memref<288x32xbf16, #tpu.memory_space<vmem>>, %arg6: memref<1x32xf32, #tpu.memory_space<vmem>>, %arg7: memref<288x16xbf16, #tpu.memory_space<vmem>>, %arg8: memref<1x16xf32, #tpu.memory_space<vmem>>, %arg9: memref<64x16xf32, #tpu.memory_space<vmem>>, %arg10: memref<1x1xf32, #tpu.memory_space<vmem>>, %arg11: memref<1x1x1xf32, #tpu.memory_space<vmem>>) attributes {dimension_semantics = [#tpu.dimension_semantics<parallel>], iteration_bounds = array<i64: 2>, scalar_prefetch = 0 : i64, scratch_operands = 0 : i64, tpu.core_type = #tpu.core_type<tc>, window_params = [{transform_indices = @transform_0, window_bounds = array<i64: 1, 64, 16>}, {pipeline_mode = #tpu.pipeline_mode<synchronous>, transform_indices = @transform_1, window_bounds = array<i64: 9, 64, 1>}, {pipeline_mode = #tpu.pipeline_mode<synchronous>, transform_indices = @transform_2, window_bounds = array<i64: 144, 32>}, {pipeline_mode = #tpu.pipeline_mode<synchronous>, transform_indices = @transform_3, window_bounds = array<i64: 1, 32>}, {pipeline_mode = #tpu.pipeline_mode<synchronous>, transform_indices = @transform_4, window_bounds = array<i64: 288, 32>}, {pipeline_mode = #tpu.pipeline_mode<synchronous>, transform_indices = @transform_5, window_bounds = array<i64: 1, 32>}, {pipeline_mode = #tpu.pipeline_mode<synchronous>, transform_indices = @transform_6, window_bounds = array<i64: 288, 16>}, {pipeline_mode = #tpu.pipeline_mode<synchronous>, transform_indices = @transform_7, window_bounds = array<i64: 1, 16>}, {pipeline_mode = #tpu.pipeline_mode<synchronous>, transform_indices = @transform_8, window_bounds = array<i64: 64, 16>}, {pipeline_mode = #tpu.pipeline_mode<synchronous>, transform_indices = @transform_9, window_bounds = array<i64: 1, 1>}, {transform_indices = @transform_10, window_bounds = array<i64: 1, 1, 1>}]} {
    %c0 = arith.constant 0 : index
    %c0_0 = arith.constant 0 : index
    %c0_1 = arith.constant 0 : index
    %0 = vector.load %arg2[%c0, %c0_0, %c0_1] : memref<9x64x1xf32, #tpu.memory_space<vmem>>, vector<9x64x1xf32>
    %c0_2 = arith.constant 0 : index
    %c0_3 = arith.constant 0 : index
    %c0_4 = arith.constant 0 : index
    %1 = vector.load %arg1[%c0_2, %c0_3, %c0_4] : memref<1x64x16xf32, #tpu.memory_space<vmem>>, vector<1x64x16xf32>
    %2 = vector.shape_cast %1 : vector<1x64x16xf32> to vector<64x16xf32>
    %c9_i32 = arith.constant 9 : i32
    %3 = tpu.dynamic_rotate %2 by %c9_i32 dim 0 : vector<64x16xf32>, i32 -> vector<64x16xf32>
    %4 = vector.extract_strided_slice %0 {offsets = [0, 0, 0], sizes = [1, 64, 1], strides = [1, 1, 1]} : vector<9x64x1xf32> to vector<1x64x1xf32>
    %5 = vector.shape_cast %4 : vector<1x64x1xf32> to vector<64x1xf32>
    %6 = vector.broadcast %5 : vector<64x1xf32> to vector<64x16xf32>
    %7 = arith.mulf %3, %6 : vector<64x16xf32>
    %c8_i32 = arith.constant 8 : i32
    %8 = tpu.dynamic_rotate %2 by %c8_i32 dim 0 : vector<64x16xf32>, i32 -> vector<64x16xf32>
    %9 = vector.extract_strided_slice %0 {offsets = [1, 0, 0], sizes = [1, 64, 1], strides = [1, 1, 1]} : vector<9x64x1xf32> to vector<1x64x1xf32>
    %10 = vector.shape_cast %9 : vector<1x64x1xf32> to vector<64x1xf32>
    %11 = vector.broadcast %10 : vector<64x1xf32> to vector<64x16xf32>
    %12 = arith.mulf %8, %11 : vector<64x16xf32>
    %c7_i32 = arith.constant 7 : i32
    %13 = tpu.dynamic_rotate %2 by %c7_i32 dim 0 : vector<64x16xf32>, i32 -> vector<64x16xf32>
    %14 = vector.extract_strided_slice %0 {offsets = [2, 0, 0], sizes = [1, 64, 1], strides = [1, 1, 1]} : vector<9x64x1xf32> to vector<1x64x1xf32>
    %15 = vector.shape_cast %14 : vector<1x64x1xf32> to vector<64x1xf32>
    %16 = vector.broadcast %15 : vector<64x1xf32> to vector<64x16xf32>
    %17 = arith.mulf %13, %16 : vector<64x16xf32>
    %c1_i32 = arith.constant 1 : i32
    %18 = tpu.dynamic_rotate %2 by %c1_i32 dim 0 : vector<64x16xf32>, i32 -> vector<64x16xf32>
    %19 = vector.extract_strided_slice %0 {offsets = [3, 0, 0], sizes = [1, 64, 1], strides = [1, 1, 1]} : vector<9x64x1xf32> to vector<1x64x1xf32>
    %20 = vector.shape_cast %19 : vector<1x64x1xf32> to vector<64x1xf32>
    %21 = vector.broadcast %20 : vector<64x1xf32> to vector<64x16xf32>
    %22 = arith.mulf %18, %21 : vector<64x16xf32>
    %c63_i32 = arith.constant 63 : i32
    %23 = tpu.dynamic_rotate %2 by %c63_i32 dim 0 : vector<64x16xf32>, i32 -> vector<64x16xf32>
    %24 = vector.extract_strided_slice %0 {offsets = [5, 0, 0], sizes = [1, 64, 1], strides = [1, 1, 1]} : vector<9x64x1xf32> to vector<1x64x1xf32>
    %25 = vector.shape_cast %24 : vector<1x64x1xf32> to vector<64x1xf32>
    %26 = vector.broadcast %25 : vector<64x1xf32> to vector<64x16xf32>
    %27 = arith.mulf %23, %26 : vector<64x16xf32>
    %c57_i32 = arith.constant 57 : i32
    %28 = tpu.dynamic_rotate %2 by %c57_i32 dim 0 : vector<64x16xf32>, i32 -> vector<64x16xf32>
    %29 = vector.extract_strided_slice %0 {offsets = [6, 0, 0], sizes = [1, 64, 1], strides = [1, 1, 1]} : vector<9x64x1xf32> to vector<1x64x1xf32>
    %30 = vector.shape_cast %29 : vector<1x64x1xf32> to vector<64x1xf32>
    %31 = vector.broadcast %30 : vector<64x1xf32> to vector<64x16xf32>
    %32 = arith.mulf %28, %31 : vector<64x16xf32>
    %c56_i32 = arith.constant 56 : i32
    %33 = tpu.dynamic_rotate %2 by %c56_i32 dim 0 : vector<64x16xf32>, i32 -> vector<64x16xf32>
    %34 = vector.extract_strided_slice %0 {offsets = [7, 0, 0], sizes = [1, 64, 1], strides = [1, 1, 1]} : vector<9x64x1xf32> to vector<1x64x1xf32>
    %35 = vector.shape_cast %34 : vector<1x64x1xf32> to vector<64x1xf32>
    %36 = vector.broadcast %35 : vector<64x1xf32> to vector<64x16xf32>
    %37 = arith.mulf %33, %36 : vector<64x16xf32>
    %c55_i32 = arith.constant 55 : i32
    %38 = tpu.dynamic_rotate %2 by %c55_i32 dim 0 : vector<64x16xf32>, i32 -> vector<64x16xf32>
    %39 = vector.extract_strided_slice %0 {offsets = [8, 0, 0], sizes = [1, 64, 1], strides = [1, 1, 1]} : vector<9x64x1xf32> to vector<1x64x1xf32>
    %40 = vector.shape_cast %39 : vector<1x64x1xf32> to vector<64x1xf32>
    %41 = vector.broadcast %40 : vector<64x1xf32> to vector<64x16xf32>
    %42 = arith.mulf %38, %41 : vector<64x16xf32>
    %43 = tpu.concatenate %7, %12, %17, %22, %2, %27, %32, %37, %42 in 1 : vector<64x16xf32>, vector<64x16xf32>, vector<64x16xf32>, vector<64x16xf32>, vector<64x16xf32>, vector<64x16xf32>, vector<64x16xf32>, vector<64x16xf32>, vector<64x16xf32> -> vector<64x144xf32>
    %44 = arith.truncf %43 : vector<64x144xf32> to vector<64x144xbf16>
    %c0_5 = arith.constant 0 : index
    %c0_6 = arith.constant 0 : index
    %45 = vector.load %arg3[%c0_5, %c0_6] : memref<144x32xbf16, #tpu.memory_space<vmem>>, vector<144x32xbf16>
    %cst = arith.constant dense<0.000000e+00> : vector<64x32xf32>
    %46 = tpu.matmul %44, %45, %cst {dimension_numbers = #tpu.dot_dimension_numbers<[1], [0], [0], [1], [0, 0, 1, 1], [], []>} : vector<64x144xbf16>, vector<144x32xbf16>, vector<64x32xf32> -> vector<64x32xf32>
    %c0_7 = arith.constant 0 : index
    %c0_8 = arith.constant 0 : index
    %47 = vector.load %arg4[%c0_7, %c0_8] : memref<1x32xf32, #tpu.memory_space<vmem>>, vector<1x32xf32>
    %48 = vector.broadcast %47 : vector<1x32xf32> to vector<64x32xf32>
    %49 = arith.addf %46, %48 : vector<64x32xf32>
    %cst_9 = arith.constant 0.000000e+00 : f32
    %50 = vector.broadcast %cst_9 : f32 to vector<64x32xf32>
    %51 = arith.maximumf %49, %50 : vector<64x32xf32>
    %c9_i32_10 = arith.constant 9 : i32
    %52 = tpu.dynamic_rotate %51 by %c9_i32_10 dim 0 : vector<64x32xf32>, i32 -> vector<64x32xf32>
    %53 = vector.extract_strided_slice %0 {offsets = [0, 0, 0], sizes = [1, 64, 1], strides = [1, 1, 1]} : vector<9x64x1xf32> to vector<1x64x1xf32>
    %54 = vector.shape_cast %53 : vector<1x64x1xf32> to vector<64x1xf32>
    %55 = vector.broadcast %54 : vector<64x1xf32> to vector<64x32xf32>
    %56 = arith.mulf %52, %55 : vector<64x32xf32>
    %c8_i32_11 = arith.constant 8 : i32
    %57 = tpu.dynamic_rotate %51 by %c8_i32_11 dim 0 : vector<64x32xf32>, i32 -> vector<64x32xf32>
    %58 = vector.extract_strided_slice %0 {offsets = [1, 0, 0], sizes = [1, 64, 1], strides = [1, 1, 1]} : vector<9x64x1xf32> to vector<1x64x1xf32>
    %59 = vector.shape_cast %58 : vector<1x64x1xf32> to vector<64x1xf32>
    %60 = vector.broadcast %59 : vector<64x1xf32> to vector<64x32xf32>
    %61 = arith.mulf %57, %60 : vector<64x32xf32>
    %c7_i32_12 = arith.constant 7 : i32
    %62 = tpu.dynamic_rotate %51 by %c7_i32_12 dim 0 : vector<64x32xf32>, i32 -> vector<64x32xf32>
    %63 = vector.extract_strided_slice %0 {offsets = [2, 0, 0], sizes = [1, 64, 1], strides = [1, 1, 1]} : vector<9x64x1xf32> to vector<1x64x1xf32>
    %64 = vector.shape_cast %63 : vector<1x64x1xf32> to vector<64x1xf32>
    %65 = vector.broadcast %64 : vector<64x1xf32> to vector<64x32xf32>
    %66 = arith.mulf %62, %65 : vector<64x32xf32>
    %c1_i32_13 = arith.constant 1 : i32
    %67 = tpu.dynamic_rotate %51 by %c1_i32_13 dim 0 : vector<64x32xf32>, i32 -> vector<64x32xf32>
    %68 = vector.extract_strided_slice %0 {offsets = [3, 0, 0], sizes = [1, 64, 1], strides = [1, 1, 1]} : vector<9x64x1xf32> to vector<1x64x1xf32>
    %69 = vector.shape_cast %68 : vector<1x64x1xf32> to vector<64x1xf32>
    %70 = vector.broadcast %69 : vector<64x1xf32> to vector<64x32xf32>
    %71 = arith.mulf %67, %70 : vector<64x32xf32>
    %c63_i32_14 = arith.constant 63 : i32
    %72 = tpu.dynamic_rotate %51 by %c63_i32_14 dim 0 : vector<64x32xf32>, i32 -> vector<64x32xf32>
    %73 = vector.extract_strided_slice %0 {offsets = [5, 0, 0], sizes = [1, 64, 1], strides = [1, 1, 1]} : vector<9x64x1xf32> to vector<1x64x1xf32>
    %74 = vector.shape_cast %73 : vector<1x64x1xf32> to vector<64x1xf32>
    %75 = vector.broadcast %74 : vector<64x1xf32> to vector<64x32xf32>
    %76 = arith.mulf %72, %75 : vector<64x32xf32>
    %c57_i32_15 = arith.constant 57 : i32
    %77 = tpu.dynamic_rotate %51 by %c57_i32_15 dim 0 : vector<64x32xf32>, i32 -> vector<64x32xf32>
    %78 = vector.extract_strided_slice %0 {offsets = [6, 0, 0], sizes = [1, 64, 1], strides = [1, 1, 1]} : vector<9x64x1xf32> to vector<1x64x1xf32>
    %79 = vector.shape_cast %78 : vector<1x64x1xf32> to vector<64x1xf32>
    %80 = vector.broadcast %79 : vector<64x1xf32> to vector<64x32xf32>
    %81 = arith.mulf %77, %80 : vector<64x32xf32>
    %c56_i32_16 = arith.constant 56 : i32
    %82 = tpu.dynamic_rotate %51 by %c56_i32_16 dim 0 : vector<64x32xf32>, i32 -> vector<64x32xf32>
    %83 = vector.extract_strided_slice %0 {offsets = [7, 0, 0], sizes = [1, 64, 1], strides = [1, 1, 1]} : vector<9x64x1xf32> to vector<1x64x1xf32>
    %84 = vector.shape_cast %83 : vector<1x64x1xf32> to vector<64x1xf32>
    %85 = vector.broadcast %84 : vector<64x1xf32> to vector<64x32xf32>
    %86 = arith.mulf %82, %85 : vector<64x32xf32>
    %c55_i32_17 = arith.constant 55 : i32
    %87 = tpu.dynamic_rotate %51 by %c55_i32_17 dim 0 : vector<64x32xf32>, i32 -> vector<64x32xf32>
    %88 = vector.extract_strided_slice %0 {offsets = [8, 0, 0], sizes = [1, 64, 1], strides = [1, 1, 1]} : vector<9x64x1xf32> to vector<1x64x1xf32>
    %89 = vector.shape_cast %88 : vector<1x64x1xf32> to vector<64x1xf32>
    %90 = vector.broadcast %89 : vector<64x1xf32> to vector<64x32xf32>
    %91 = arith.mulf %87, %90 : vector<64x32xf32>
    %92 = tpu.concatenate %56, %61, %66, %71, %51, %76, %81, %86, %91 in 1 : vector<64x32xf32>, vector<64x32xf32>, vector<64x32xf32>, vector<64x32xf32>, vector<64x32xf32>, vector<64x32xf32>, vector<64x32xf32>, vector<64x32xf32>, vector<64x32xf32> -> vector<64x288xf32>
    %93 = arith.truncf %92 : vector<64x288xf32> to vector<64x288xbf16>
    %c0_18 = arith.constant 0 : index
    %c0_19 = arith.constant 0 : index
    %94 = vector.load %arg5[%c0_18, %c0_19] : memref<288x32xbf16, #tpu.memory_space<vmem>>, vector<288x32xbf16>
    %cst_20 = arith.constant dense<0.000000e+00> : vector<64x32xf32>
    %95 = tpu.matmul %93, %94, %cst_20 {dimension_numbers = #tpu.dot_dimension_numbers<[1], [0], [0], [1], [0, 0, 1, 1], [], []>} : vector<64x288xbf16>, vector<288x32xbf16>, vector<64x32xf32> -> vector<64x32xf32>
    %c0_21 = arith.constant 0 : index
    %c0_22 = arith.constant 0 : index
    %96 = vector.load %arg6[%c0_21, %c0_22] : memref<1x32xf32, #tpu.memory_space<vmem>>, vector<1x32xf32>
    %97 = vector.broadcast %96 : vector<1x32xf32> to vector<64x32xf32>
    %98 = arith.addf %95, %97 : vector<64x32xf32>
    %cst_23 = arith.constant 0.000000e+00 : f32
    %99 = vector.broadcast %cst_23 : f32 to vector<64x32xf32>
    %100 = arith.maximumf %98, %99 : vector<64x32xf32>
    %c9_i32_24 = arith.constant 9 : i32
    %101 = tpu.dynamic_rotate %100 by %c9_i32_24 dim 0 : vector<64x32xf32>, i32 -> vector<64x32xf32>
    %102 = vector.extract_strided_slice %0 {offsets = [0, 0, 0], sizes = [1, 64, 1], strides = [1, 1, 1]} : vector<9x64x1xf32> to vector<1x64x1xf32>
    %103 = vector.shape_cast %102 : vector<1x64x1xf32> to vector<64x1xf32>
    %104 = vector.broadcast %103 : vector<64x1xf32> to vector<64x32xf32>
    %105 = arith.mulf %101, %104 : vector<64x32xf32>
    %c8_i32_25 = arith.constant 8 : i32
    %106 = tpu.dynamic_rotate %100 by %c8_i32_25 dim 0 : vector<64x32xf32>, i32 -> vector<64x32xf32>
    %107 = vector.extract_strided_slice %0 {offsets = [1, 0, 0], sizes = [1, 64, 1], strides = [1, 1, 1]} : vector<9x64x1xf32> to vector<1x64x1xf32>
    %108 = vector.shape_cast %107 : vector<1x64x1xf32> to vector<64x1xf32>
    %109 = vector.broadcast %108 : vector<64x1xf32> to vector<64x32xf32>
    %110 = arith.mulf %106, %109 : vector<64x32xf32>
    %c7_i32_26 = arith.constant 7 : i32
    %111 = tpu.dynamic_rotate %100 by %c7_i32_26 dim 0 : vector<64x32xf32>, i32 -> vector<64x32xf32>
    %112 = vector.extract_strided_slice %0 {offsets = [2, 0, 0], sizes = [1, 64, 1], strides = [1, 1, 1]} : vector<9x64x1xf32> to vector<1x64x1xf32>
    %113 = vector.shape_cast %112 : vector<1x64x1xf32> to vector<64x1xf32>
    %114 = vector.broadcast %113 : vector<64x1xf32> to vector<64x32xf32>
    %115 = arith.mulf %111, %114 : vector<64x32xf32>
    %c1_i32_27 = arith.constant 1 : i32
    %116 = tpu.dynamic_rotate %100 by %c1_i32_27 dim 0 : vector<64x32xf32>, i32 -> vector<64x32xf32>
    %117 = vector.extract_strided_slice %0 {offsets = [3, 0, 0], sizes = [1, 64, 1], strides = [1, 1, 1]} : vector<9x64x1xf32> to vector<1x64x1xf32>
    %118 = vector.shape_cast %117 : vector<1x64x1xf32> to vector<64x1xf32>
    %119 = vector.broadcast %118 : vector<64x1xf32> to vector<64x32xf32>
    %120 = arith.mulf %116, %119 : vector<64x32xf32>
    %c63_i32_28 = arith.constant 63 : i32
    %121 = tpu.dynamic_rotate %100 by %c63_i32_28 dim 0 : vector<64x32xf32>, i32 -> vector<64x32xf32>
    %122 = vector.extract_strided_slice %0 {offsets = [5, 0, 0], sizes = [1, 64, 1], strides = [1, 1, 1]} : vector<9x64x1xf32> to vector<1x64x1xf32>
    %123 = vector.shape_cast %122 : vector<1x64x1xf32> to vector<64x1xf32>
    %124 = vector.broadcast %123 : vector<64x1xf32> to vector<64x32xf32>
    %125 = arith.mulf %121, %124 : vector<64x32xf32>
    %c57_i32_29 = arith.constant 57 : i32
    %126 = tpu.dynamic_rotate %100 by %c57_i32_29 dim 0 : vector<64x32xf32>, i32 -> vector<64x32xf32>
    %127 = vector.extract_strided_slice %0 {offsets = [6, 0, 0], sizes = [1, 64, 1], strides = [1, 1, 1]} : vector<9x64x1xf32> to vector<1x64x1xf32>
    %128 = vector.shape_cast %127 : vector<1x64x1xf32> to vector<64x1xf32>
    %129 = vector.broadcast %128 : vector<64x1xf32> to vector<64x32xf32>
    %130 = arith.mulf %126, %129 : vector<64x32xf32>
    %c56_i32_30 = arith.constant 56 : i32
    %131 = tpu.dynamic_rotate %100 by %c56_i32_30 dim 0 : vector<64x32xf32>, i32 -> vector<64x32xf32>
    %132 = vector.extract_strided_slice %0 {offsets = [7, 0, 0], sizes = [1, 64, 1], strides = [1, 1, 1]} : vector<9x64x1xf32> to vector<1x64x1xf32>
    %133 = vector.shape_cast %132 : vector<1x64x1xf32> to vector<64x1xf32>
    %134 = vector.broadcast %133 : vector<64x1xf32> to vector<64x32xf32>
    %135 = arith.mulf %131, %134 : vector<64x32xf32>
    %c55_i32_31 = arith.constant 55 : i32
    %136 = tpu.dynamic_rotate %100 by %c55_i32_31 dim 0 : vector<64x32xf32>, i32 -> vector<64x32xf32>
    %137 = vector.extract_strided_slice %0 {offsets = [8, 0, 0], sizes = [1, 64, 1], strides = [1, 1, 1]} : vector<9x64x1xf32> to vector<1x64x1xf32>
    %138 = vector.shape_cast %137 : vector<1x64x1xf32> to vector<64x1xf32>
    %139 = vector.broadcast %138 : vector<64x1xf32> to vector<64x32xf32>
    %140 = arith.mulf %136, %139 : vector<64x32xf32>
    %141 = tpu.concatenate %105, %110, %115, %120, %100, %125, %130, %135, %140 in 1 : vector<64x32xf32>, vector<64x32xf32>, vector<64x32xf32>, vector<64x32xf32>, vector<64x32xf32>, vector<64x32xf32>, vector<64x32xf32>, vector<64x32xf32>, vector<64x32xf32> -> vector<64x288xf32>
    %142 = arith.truncf %141 : vector<64x288xf32> to vector<64x288xbf16>
    %c0_32 = arith.constant 0 : index
    %c0_33 = arith.constant 0 : index
    %143 = vector.load %arg7[%c0_32, %c0_33] : memref<288x16xbf16, #tpu.memory_space<vmem>>, vector<288x16xbf16>
    %cst_34 = arith.constant dense<0.000000e+00> : vector<64x16xf32>
    %144 = tpu.matmul %142, %143, %cst_34 {dimension_numbers = #tpu.dot_dimension_numbers<[1], [0], [0], [1], [0, 0, 1, 1], [], []>} : vector<64x288xbf16>, vector<288x16xbf16>, vector<64x16xf32> -> vector<64x16xf32>
    %c0_35 = arith.constant 0 : index
    %c0_36 = arith.constant 0 : index
    %145 = vector.load %arg8[%c0_35, %c0_36] : memref<1x16xf32, #tpu.memory_space<vmem>>, vector<1x16xf32>
    %146 = vector.broadcast %145 : vector<1x16xf32> to vector<64x16xf32>
    %147 = arith.addf %144, %146 : vector<64x16xf32>
    %cst_37 = arith.constant 0.000000e+00 : f32
    %148 = vector.broadcast %cst_37 : f32 to vector<64x16xf32>
    %149 = arith.maximumf %147, %148 : vector<64x16xf32>
    %c0_38 = arith.constant 0 : index
    %c0_39 = arith.constant 0 : index
    %150 = vector.load %arg9[%c0_38, %c0_39] : memref<64x16xf32, #tpu.memory_space<vmem>>, vector<64x16xf32>
    %151 = arith.mulf %149, %150 : vector<64x16xf32>
    %cst_40 = arith.constant dense<0.000000e+00> : vector<64xf32>
    %152 = vector.multi_reduction <add>, %151, %cst_40 [1] : vector<64x16xf32> to vector<64xf32>
    %153 = vector.shape_cast %152 : vector<64xf32> to vector<64x1xf32>
    %cst_41 = arith.constant dense<0.000000e+00> : vector<1xf32>
    %154 = vector.multi_reduction <add>, %153, %cst_41 [0] : vector<64x1xf32> to vector<1xf32>
    %155 = vector.shape_cast %154 : vector<1xf32> to vector<1x1xf32>
    %c0_42 = arith.constant 0 : index
    %c0_43 = arith.constant 0 : index
    %156 = vector.load %arg10[%c0_42, %c0_43] : memref<1x1xf32, #tpu.memory_space<vmem>>, vector<1x1xf32>
    %157 = arith.addf %155, %156 : vector<1x1xf32>
    %c0_44 = arith.constant 0 : index
    %c0_45 = arith.constant 0 : index
    %c0_46 = arith.constant 0 : index
    %158 = vector.load %arg11[%c0_44, %c0_45, %c0_46] : memref<1x1x1xf32, #tpu.memory_space<vmem>>, vector<1x1x1xf32>
    %159 = vector.shape_cast %158 : vector<1x1x1xf32> to vector<1x1xf32>
    %160 = vector.shape_cast %157 : vector<1x1xf32> to vector<1x1x1xf32>
    tpu.vector_store %arg11[%c0_44, %c0_45, %c0_46], %160 {strides = array<i32>} : memref<1x1x1xf32, #tpu.memory_space<vmem>>, vector<1x1x1xf32>,
    return
  }
  func.func @transform_0(%arg0: i32) -> (i32, i32, i32) {
    %c0_i32 = arith.constant 0 : i32
    %c0_i32_0 = arith.constant 0 : i32
    %c0_i32_1 = arith.constant 0 : i32
    return %arg0, %c0_i32, %c0_i32_0 : i32, i32, i32
  }
  func.func @transform_1(%arg0: i32) -> (i32, i32, i32) {
    %c0_i32 = arith.constant 0 : i32
    %c0_i32_0 = arith.constant 0 : i32
    %c0_i32_1 = arith.constant 0 : i32
    %c0_i32_2 = arith.constant 0 : i32
    return %c0_i32, %c0_i32_0, %c0_i32_1 : i32, i32, i32
  }
  func.func @transform_2(%arg0: i32) -> (i32, i32) {
    %c0_i32 = arith.constant 0 : i32
    %c0_i32_0 = arith.constant 0 : i32
    %c0_i32_1 = arith.constant 0 : i32
    return %c0_i32, %c0_i32_0 : i32, i32
  }
  func.func @transform_3(%arg0: i32) -> (i32, i32) {
    %c0_i32 = arith.constant 0 : i32
    %c0_i32_0 = arith.constant 0 : i32
    %c0_i32_1 = arith.constant 0 : i32
    return %c0_i32, %c0_i32_0 : i32, i32
  }
  func.func @transform_4(%arg0: i32) -> (i32, i32) {
    %c0_i32 = arith.constant 0 : i32
    %c0_i32_0 = arith.constant 0 : i32
    %c0_i32_1 = arith.constant 0 : i32
    return %c0_i32, %c0_i32_0 : i32, i32
  }
  func.func @transform_5(%arg0: i32) -> (i32, i32) {
    %c0_i32 = arith.constant 0 : i32
    %c0_i32_0 = arith.constant 0 : i32
    %c0_i32_1 = arith.constant 0 : i32
    return %c0_i32, %c0_i32_0 : i32, i32
  }
  func.func @transform_6(%arg0: i32) -> (i32, i32) {
    %c0_i32 = arith.constant 0 : i32
    %c0_i32_0 = arith.constant 0 : i32
    %c0_i32_1 = arith.constant 0 : i32
    return %c0_i32, %c0_i32_0 : i32, i32
  }
  func.func @transform_7(%arg0: i32) -> (i32, i32) {
    %c0_i32 = arith.constant 0 : i32
    %c0_i32_0 = arith.constant 0 : i32
    %c0_i32_1 = arith.constant 0 : i32
    return %c0_i32, %c0_i32_0 : i32, i32
  }
  func.func @transform_8(%arg0: i32) -> (i32, i32) {
    %c0_i32 = arith.constant 0 : i32
    %c0_i32_0 = arith.constant 0 : i32
    %c0_i32_1 = arith.constant 0 : i32
    return %c0_i32, %c0_i32_0 : i32, i32
  }
  func.func @transform_9(%arg0: i32) -> (i32, i32) {
    %c0_i32 = arith.constant 0 : i32
    %c0_i32_0 = arith.constant 0 : i32
    %c0_i32_1 = arith.constant 0 : i32
    return %c0_i32, %c0_i32_0 : i32, i32
  }
  func.func @transform_10(%arg0: i32) -> (i32, i32, i32) {
    %c0_i32 = arith.constant 0 : i32
    %c0_i32_0 = arith.constant 0 : i32
    %c0_i32_1 = arith.constant 0 : i32
    return %arg0, %c0_i32, %c0_i32_0 : i32, i32, i32
  }
}

</mosaic_0001>

<bundles_post_ra>
// kernel: rdiscriminator_forward.1
= control target key start
LH: loop header
LB: loop body
LE: loop exit
PB: predicated region body
PF: predicated region fallthrough
CT: control target
= control target key end

     0   :  { %s3415_s15 = smov 0   ;;  %s4974_s0 = inlined_call_operand.vmem [shape: f32[2,64,16], index: 0, kind: input, shape index: {}]   ;;  %s4975_s1 = inlined_call_operand.vmem [shape: f32[9,64,1], index: 1, kind: input, shape index: {}]   ;;  %s4976_s2 = inlined_call_operand.vmem [shape: bf16[144,32], index: 2, kind: input, shape index: {}]   ;;  %s4977_s3 = inlined_call_operand.vmem [shape: f32[1,32], index: 3, kind: input, shape index: {}]   ;;  %s4978_s4 = inlined_call_operand.vmem [shape: bf16[288,32], index: 4, kind: input, shape index: {}]   ;;  %s4979_s5 = inlined_call_operand.vmem [shape: f32[1,32], index: 5, kind: input, shape index: {}]   ;;  %s4980_s6 = inlined_call_operand.vmem [shape: bf16[288,16], index: 6, kind: input, shape index: {}]   ;;  %s4981_s7 = inlined_call_operand.vmem [shape: f32[1,16], index: 7, kind: input, shape index: {}]   ;;  %s4982_s8 = inlined_call_operand.vmem [shape: f32[64,16], index: 8, kind: input, shape index: {}]   ;;  %s4983_s9 = inlined_call_operand.<no memory space> [shape: f32[1,1], index: 9, kind: input, shape index: {}]   ;;  %s4984_s10 = inlined_call_operand.vmem [shape: f32[2,1,1], index: 10, kind: output, shape index: {}]  }
   0x1   :  { %v15_v0 = vstv %s4983_s9 }
   0x2   :  { %16 = vst [vmem:[#allocation2] sm:$0x1] %v15_v0 }
   0x3 LB: > { %s2712_s16 = sadd.s32 4294967295, %s3347_s15   ;;  %p2716_p0 = scmp.ge.s32.totalorder %s3347_s15, 1  ;;  %s3347_s15 = sphi %s3415_s15, %s22_s15  }
   0x4   : > { %p314_p1 = scmp.lt.s32.totalorder %s3347_s15, 3 }
   0x6   : > { %p315_p2 = pnand %p2716_p0, %p314_p1 }
   0x8   : > { %318 = sbr.rel (%p315_p2) target bundleno = 1520 (0x5f0), region = 60 }
   0xf   : > { %v375_v1 = vld [vmem:[%s4975_s1 + $0x80] sm:$0xff]  ;;  %v3349_v3 = vmov 0   ;;  %v376_v4 = vld [vmem:[%s4975_s1 + $0x88] sm:$0xff]  ;;  %v370_v14 = vld [vmem:[%s4975_s1 + $0x58] sm:$0xff]  ;;  %p350_p3 = scmp.lt.s32.totalorder %s2712_s16, 1  ;;  %v439_v38 = vlaneseq  ;;  %s3350_s20 = smov 64  }
  0x10   : > { %v367_v2 = vld [vmem:[%s4975_s1 + $0x40] sm:$0xff]  ;;  %2915 = vset.pattern.permute.xlu1 %v3349_v3  ;;  %2914 = vset.pattern.permute.xlu0 %v3349_v3  ;;  %v368_v5 = vld [vmem:[%s4975_s1 + $0x48] sm:$0xff]  ;;  %v369_v15 = vld [vmem:[%s4975_s1 + $0x50] sm:$0xff]  ;;  %s3351_s24 = smov 32   ;;  %s3352_s25 = smov 16   ;;  %vm1075_vm2 = vcmask 130048  }
  0x11   : > { %565 = vperm.xlu1 %2915, %v375_v1   ;;  %500 = vperm.xlu0 %2914, %v367_v2   ;;  %v384_v6 = vld [vmem:[%s4975_s1 + $0xc8] sm:$0xff]  ;;  %v383_v7 = vld [vmem:[%s4975_s1 + $0xc0] sm:$0xff]  ;;  %v378_v16 = vld [vmem:[%s4975_s1 + $0x98] sm:$0xff]  ;;  %s5196_s16 = smov (!%p350_p3, %s2712_s16), 1  ;;  %v3552_v41 = vshrl.u32 %v439_v38, 7  ;;  %s3353_s28 = smov 48  }
  0x12   : > { %1237 = vmatprep.subr.bf16.mxu0 %v3349_v3  ;;  %v392_v8 = vld [vmem:[%s4975_s1 + $0x148] sm:$0xff]  ;;  %v391_v9 = vld [vmem:[%s4975_s1 + $0x140] sm:$0xff]  ;;  %v377_v17 = vld [vmem:[%s4975_s1 + $0x90] sm:$0xff]  ;;  %s2781_s11 = sshll.u32 %s5196_s16, 6  ;;  %s3354_s29 = smov 80   ;;  %vm1084_vm3 = vcmask 261120  }
  0x13   : > { %v400_v10 = vld [vmem:[%s4975_s1 + $0x188] sm:$0xff]  ;;  %v399_v11 = vld [vmem:[%s4975_s1 + $0x180] sm:$0xff]  ;;  %v386_v18 = vld [vmem:[%s4975_s1 + $0xd8] sm:$0xff]  ;;  %s3550_s19 = scalar_lea.vmem %s4974_s0, %s2781_s11  ;;  %vm554_vm0 = vcmp.lt.s32.totalorder %v3552_v41, 7  ;;  %vm441_vm1 = vcmp.lt.s32.totalorder %v3552_v41, 1  ;;  %s3355_s30 = smov 96  }
  0x14   : > { %v408_v12 = vld [vmem:[%s4975_s1 + $0x1c8] sm:$0xff]  ;;  %v407_v13 = vld [vmem:[%s4975_s1 + $0x1c0] sm:$0xff]  ;;  %v385_v19 = vld [vmem:[%s4975_s1 + $0xd0] sm:$0xff]  ;;  %s3356_s11 = smov 112   ;;  %vm1093_vm4 = vcmask 392192   ;;  %vm1102_vm5 = vcmask 523264  }
  0x15   : > { %570 = vperm.xlu1 %2915, %v376_v4   ;;  %505 = vperm.xlu0 %2914, %v368_v5   ;;  %v394_v20 = vld [vmem:[%s4975_s1 + $0x158] sm:$0xff]  ;;  %v393_v21 = vld [vmem:[%s4975_s1 + $0x150] sm:$0xff]  ;;  %v372_v26 = vld [vmem:[%s4975_s1 + $0x68] sm:$0xff]  ;;  %vm1111_vm6 = vcmask 654336   ;;  %vm1120_vm7 = vcmask 785408   ;;  %vm1129_vm8 = vcmask 916480  }
  0x16   : > { %v402_v22 = vld [vmem:[%s4975_s1 + $0x198] sm:$0xff]  ;;  %v401_v23 = vld [vmem:[%s4975_s1 + $0x190] sm:$0xff]  ;;  %v371_v27 = vld [vmem:[%s4975_s1 + $0x60] sm:$0xff]  ;;  %vm2663_vm9 = vcmask 0  }
  0x17   : > { %v410_v24 = vld [vmem:[%s4975_s1 + $0x1d8] sm:$0xff]  ;;  %v409_v25 = vld [vmem:[%s4975_s1 + $0x1d0] sm:$0xff]  ;;  %v380_v28 = vld [vmem:[%s4975_s1 + $0xa8] sm:$0xff] }
  0x18   : > { %v379_v29 = vld [vmem:[%s4975_s1 + $0xa0] sm:$0xff]  ;;  %v388_v30 = vld [vmem:[%s4975_s1 + $0xe8] sm:$0xff]  ;;  %v374_v39 = vld [vmem:[%s4975_s1 + $0x78] sm:$0xff] }
  0x19   : > { %618 = vperm.xlu1 %2915, %v384_v6   ;;  %613 = vperm.xlu0 %2914, %v383_v7   ;;  %v387_v31 = vld [vmem:[%s4975_s1 + $0xe0] sm:$0xff]  ;;  %v396_v32 = vld [vmem:[%s4975_s1 + $0x168] sm:$0xff]  ;;  %v373_v40 = vld [vmem:[%s4975_s1 + $0x70] sm:$0xff] }
  0x1a   : > { %v395_v33 = vld [vmem:[%s4975_s1 + $0x160] sm:$0xff]  ;;  %v404_v34 = vld [vmem:[%s4975_s1 + $0x1a8] sm:$0xff]  ;;  %v3555_v42 = vld [vmem:[%s3550_s19 + $0x38] sm:$0xff] }
  0x1b   : > { %v403_v35 = vld [vmem:[%s4975_s1 + $0x1a0] sm:$0xff]  ;;  %v412_v36 = vld [vmem:[%s4975_s1 + $0x1e8] sm:$0xff]  ;;  %v3558_v43 = vld [vmem:[%s3550_s19 + $0x30] sm:$0xff]  ;;  %v553_v46 = vrot.slane %v3555_v42, 1  ;;  %v438_v51 = vrot.slane %v3555_v42, 7 }
  0x1c   : > { %v411_v37 = vld [vmem:[%s4975_s1 + $0x1e0] sm:$0xff]  ;;  %v382_v44 = vld [vmem:[%s4975_s1 + $0xb8] sm:$0xff]  ;;  %v381_v45 = vld [vmem:[%s4975_s1 + $0xb0] sm:$0xff]  ;;  %v552_v47 = vrot.slane %v3558_v43, 1  ;;  %v437_v52 = vrot.slane %v3558_v43, 7 }
  0x1d   : > { %666 = vperm.xlu1 %2915, %v392_v8   ;;  %661 = vperm.xlu0 %2914, %v391_v9   ;;  %v390_v49 = vld [vmem:[%s4975_s1 + $0xf8] sm:$0xff]  ;;  %v389_v50 = vld [vmem:[%s4975_s1 + $0xf0] sm:$0xff]  ;;  %v360_v60 = vld [vmem:[%s4975_s1 + $0x8] sm:$0xff] }
  0x1e   : > { %v3575_v48 = vsel %vm554_vm0, %v552_v47, %v553_v46  ;;  %v3592_v53 = vsel %vm441_vm1, %v437_v52, %v438_v51  ;;  %v398_v54 = vld [vmem:[%s4975_s1 + $0x178] sm:$0xff]  ;;  %v397_v55 = vld [vmem:[%s4975_s1 + $0x170] sm:$0xff]  ;;  %v359_v61 = vld [vmem:[%s4975_s1] sm:$0xff] }
  0x1f   : > { %v406_v56 = vld [vmem:[%s4975_s1 + $0x1b8] sm:$0xff]  ;;  %v405_v57 = vld [vmem:[%s4975_s1 + $0x1b0] sm:$0xff]  ;;  %v416_v62 = vld [vmem:[%s4975_s1 + $0x208] sm:$0xff] }
  0x20   : > { %v414_v58 = vld [vmem:[%s4975_s1 + $0x1f8] sm:$0xff]  ;;  %v413_v59 = vld [vmem:[%s4975_s1 + $0x1f0] sm:$0xff]  ;;  %v415_v63 = vld [vmem:[%s4975_s1 + $0x200] sm:$0xff] }
  0x21   : > { %714 = vperm.xlu1 %2915, %v400_v10   ;;  %709 = vperm.xlu0 %2914, %v399_v11   ;;  %v362_v0 = vld [vmem:[%s4975_s1 + $0x18] sm:$0xff]  ;;  %v361_v1 = vld [vmem:[%s4975_s1 + $0x10] sm:$0xff]  ;;  %v3631_v2 = vld [vmem:[%s3550_s19] sm:$0xff] }
  0x22   : > { %v3634_v4 = vld [vmem:[%s3550_s19 + $0x8] sm:$0xff]  ;;  %v418_v6 = vld [vmem:[%s4975_s1 + $0x218] sm:$0xff]  ;;  %v3296_v7 = vld [vmem:[%s4976_s2] sm:$0xff]  }
  0x23   : > { %v2916_v5 = vpack.i.bf16 %v3634_v4, %v3631_v2  ;;  %v364_v8 = vld [vmem:[%s4975_s1 + $0x28] sm:$0xff]  ;;  %v417_v9 = vld [vmem:[%s4975_s1 + $0x210] sm:$0xff]  ;;  %1238 = vmatpush1.bf16.msra.mxu0 %v3296_v7  ;;  %v363_v11 = vld [vmem:[%s4975_s1 + $0x20] sm:$0xff] }
  0x24   : > { %1239 = vmatprep.subr.bf16.mxu0 %v3349_v3  ;;  %v3297_v10 = vld [vmem:[%s4976_s2 + $0x8] sm:$0xff]  }
  0x25   : > { %762 = vperm.xlu1 %2915, %v408_v12   ;;  %757 = vperm.xlu0 %2914, %v407_v13   ;;  %v3298_v12 = vld [vmem:[%s4976_s2 + $0x10] sm:$0xff]   ;;  %v3299_v13 = vld [vmem:[%s4976_s2 + $0x18] sm:$0xff]  }
  0x27   : > { %1240 = vmatpush1.bf16.msra.mxu0 %v3297_v10 }
  0x28   : > { %1241 = vmatprep.subr.bf16.mxu0 %v3349_v3 }
  0x29   : > { %515 = vperm.xlu1 %2915, %v370_v14   ;;  %510 = vperm.xlu0 %2914, %v369_v15   ;;  %v3300_v14 = vld [vmem:[%s4976_s2 + $0x20] sm:$0xff]   ;;  %v546_v15 = vrot.slane %v3631_v2, 1 }
  0x2b   : > { %1242 = vmatpush1.bf16.msra.mxu0 %v3298_v12 }
  0x2c   : > { %1243 = vmatprep.subr.bf16.mxu0 %v3349_v3 }
  0x2d   : > { %580 = vperm.xlu1 %2915, %v378_v16   ;;  %575 = vperm.xlu0 %2914, %v377_v17   ;;  %v547_v16 = vrot.slane %v3634_v4, 1 }
  0x2f   : > { %1244 = vmatpush1.bf16.msra.mxu0 %v3299_v13 }
  0x30   : > { %1245 = vmatprep.subr.bf16.mxu0 %v3349_v3 }
  0x31   : > { %628 = vperm.xlu1 %2915, %v386_v18   ;;  %623 = vperm.xlu0 %2914, %v385_v19   ;;  %v3301_v19 = vld [vmem:[%s4976_s2 + $0x28] sm:$0xff]  }
  0x33   : > { %1246 = vmatpush1.bf16.msra.mxu0 %v3300_v14 }
  0x34   : > { %1247 = vmatprep.subr.bf16.mxu0 %v3349_v3 }
  0x35   : > { %676 = vperm.xlu1 %2915, %v394_v20   ;;  %671 = vperm.xlu0 %2914, %v393_v21   ;;  %v3684_v20 = vsel %vm554_vm0, %v553_v46, %v546_v15  ;;  %v3688_v21 = vsel %vm554_vm0, %v546_v15, %v547_v16 }
  0x37   : > { %1248 = vmatpush1.bf16.msra.mxu0 %v3301_v19 }
  0x38   : > { %1249 = vmatprep.subr.bf16.mxu0 %v3349_v3 }
  0x39   : > { %724 = vperm.xlu1 %2915, %v402_v22   ;;  %719 = vperm.xlu0 %2914, %v401_v23   ;;  %v431_v22 = vrot.slane %v3631_v2, 7  ;;  %v432_v23 = vrot.slane %v3634_v4, 7 }
  0x3d   : > { %772 = vperm.xlu1 %2915, %v410_v24   ;;  %767 = vperm.xlu0 %2914, %v409_v25   ;;  %v3693_v24 = vld [vmem:[%s3550_s19 + $0x10] sm:$0xff] }
  0x3e   : > { %v433_v46 = vrot.slane %v3693_v24, 7 }
  0x41   : > { %525 = vperm.xlu1 %2915, %v372_v26   ;;  %520 = vperm.xlu0 %2914, %v371_v27   ;;  %v3302_v27 = vld [vmem:[%s4976_s2 + $0x30] sm:$0xff]  }
  0x42   : > { %1250 = vmatpush1.bf16.msra.mxu0 %v3302_v27 }
  0x43   : > { %1251 = vmatprep.subr.bf16.mxu0 %v3349_v3 }
  0x45   : > { %590 = vperm.xlu1 %2915, %v380_v28   ;;  %585 = vperm.xlu0 %2914, %v379_v29  }
  0x49   : > { %638 = vperm.xlu1 %2915, %v388_v30   ;;  %633 = vperm.xlu0 %2914, %v387_v31  }
  0x4d   : > { %686 = vperm.xlu1 %2915, %v396_v32   ;;  %681 = vperm.xlu0 %2914, %v395_v33   ;;  %v3713_v32 = vsel %vm441_vm1, %v431_v22, %v432_v23  ;;  %v3719_v33 = vsel %vm441_vm1, %v438_v51, %v431_v22 }
  0x51   : > { %734 = vperm.xlu1 %2915, %v404_v34   ;;  %729 = vperm.xlu0 %2914, %v403_v35   ;;  %v548_v34 = vrot.slane %v3693_v24, 1 }
  0x55   : > { %782 = vperm.xlu1 %2915, %v412_v36   ;;  %777 = vperm.xlu0 %2914, %v411_v37  }
  0x59   : > { %535 = vperm.xlu1 %2915, %v374_v39   ;;  %530 = vperm.xlu0 %2914, %v373_v40   ;;  %v3303_v39 = vld [vmem:[%s4976_s2 + $0x38] sm:$0xff]  }
  0x5a   : > { %1252 = vmatpush1.bf16.msra.mxu0 %v3303_v39 }
  0x5b   : > { %1253 = vmatprep.subr.bf16.mxu0 %v3349_v3  ;;  %v3756_v3 = vsel %vm441_vm1, %v432_v23, %v433_v46 }
  0x5d   : > { %600 = vperm.xlu1 %2915, %v382_v44   ;;  %595 = vperm.xlu0 %2914, %v381_v45   ;;  %v3738_v45 = vsel %vm554_vm0, %v547_v16, %v548_v34  ;;  %v3795_v16 = vld [vmem:[%s3550_s19 + $0x20] sm:$0xff] }
  0x61   : > { %648 = vperm.xlu1 %2915, %v390_v49   ;;  %643 = vperm.xlu0 %2914, %v389_v50  }
  0x65   : > { %696 = vperm.xlu1 %2915, %v398_v54   ;;  %691 = vperm.xlu0 %2914, %v397_v55   ;;  %v3304_v54 = vld [vmem:[%s4976_s2 + $0x40] sm:$0xff]  }
  0x66   : > { %1254 = vmatpush1.bf16.msra.mxu0 %v3304_v54 }
  0x69   : > { %744 = vperm.xlu1 %2915, %v406_v56   ;;  %739 = vperm.xlu0 %2914, %v405_v57  }
  0x6d   : > { %792 = vperm.xlu1 %2915, %v414_v58   ;;  %787 = vperm.xlu0 %2914, %v413_v59  }
  0x71   : > { %457 = vperm.xlu1 %2915, %v360_v60   ;;  %452 = vperm.xlu0 %2914, %v359_v61  }
  0x75   : > { %810 = vperm.xlu1 %2915, %v416_v62   ;;  %805 = vperm.xlu0 %2914, %v415_v63   ;;  %v3768_v63 = vld [vmem:[%s3550_s19 + $0x18] sm:$0xff] }
  0x76   : > { %v549_v7 = vrot.slane %v3768_v63, 1  ;;  %v434_v14 = vrot.slane %v3768_v63, 7 }
  0x78   : > { %v3791_v13 = vsel %vm554_vm0, %v548_v34, %v549_v7  ;;  %v3808_v27 = vsel %vm441_vm1, %v433_v46, %v434_v14 }
  0x79   : > { %467 = vperm.xlu1 %2915, %v362_v0   ;;  %462 = vperm.xlu0 %2914, %v361_v1  }
  0x7d   : > { %820 = vperm.xlu0 %2914, %v418_v6   ;;  %2917 = vrot.lane.b32.xlu1 %v2916_v5, %s3350_s20 }
  0x81   : > { %477 = vperm.xlu0 %2914, %v364_v8   ;;  %815 = vperm.xlu1 %2915, %v417_v9  }
  0x85   : > { %472 = vperm.xlu1 %2915, %v363_v11  }
  0x90   : > { %v3673_v17 = vpop.permute.xlu1 %565  ;;  %v3675_v18 = vpop.permute.xlu0 %500 }
  0x91   : > { %5064 = vst [vmem:[#allocation3_spill] sm:$0xff] %v3673_v17  ;;  %5065 = vst [vmem:[#allocation4_spill] sm:$0xff] %v3675_v18  ;;  %v603_v28 = vmul.f32 %v3673_v17, %v3684_v20  ;;  %v538_v29 = vmul.f32 %v3675_v18, %v3555_v42 }
  0x94   : > { %v3696_v25 = vpop.permute.xlu1 %570  ;;  %v3698_v26 = vpop.permute.xlu0 %505 }
  0x95   : > { %5066 = vst [vmem:[#allocation5_spill] sm:$0xff] %v3696_v25  ;;  %5067 = vst [vmem:[#allocation6_spill] sm:$0xff] %v3698_v26  ;;  %v604_v30 = vmul.f32 %v3696_v25, %v3688_v21  ;;  %v539_v31 = vmul.f32 %v3698_v26, %v3631_v2 }
  0x97   : > { %v2926_v35 = vpack.i.bf16 %v604_v30, %v603_v28  ;;  %v2921_v36 = vpack.i.bf16 %v539_v31, %v538_v29  ;;  %v550_v28 = vrot.slane %v3795_v16, 1 }
  0x98   : > { %v3723_v37 = vpop.permute.xlu1 %618  ;;  %v3725_v38 = vpop.permute.xlu0 %613 }
  0x99   : > { %5068 = vst [vmem:[#allocation7_spill] sm:$0xff] %v3723_v37  ;;  %5069 = vst [vmem:[#allocation8_spill] sm:$0xff] %v3725_v38  ;;  %v652_v40 = vmul.f32 %v3723_v37, %v3713_v32  ;;  %v651_v44 = vmul.f32 %v3725_v38, %v3719_v33  ;;  %2927 = vrot.lane.b32.xlu1 %v2926_v35, %s3351_s24  ;;  %2922 = vrot.lane.b32.xlu0 %v2921_v36, %s3352_s25 }
  0x9a   : > { %v2961_v36 = vpack.i.bf16 %v3768_v63, %v3693_v24  ;;  %v3824_v39 = vsel %vm554_vm0, %v549_v7, %v550_v28 }
  0x9b   : > { %v2931_v49 = vpack.i.bf16 %v652_v40, %v651_v44  ;;  %v435_v40 = vrot.slane %v3795_v16, 7 }
  0x9c   : > { %v3742_v50 = vpop.permute.xlu1 %666  ;;  %v3744_v51 = vpop.permute.xlu0 %661 }
  0x9d   : > { %5070 = vst [vmem:[#allocation9_spill] sm:$0xff] %v3744_v51  ;;  %v700_v55 = vmul.f32 %v3742_v50, %v3738_v45  ;;  %v699_v56 = vmul.f32 %v3744_v51, %v3688_v21  ;;  %2932 = vrot.lane.b32.xlu0 %v2931_v49, %s3353_s28 }
  0x9f   : > { %v2936_v57 = vpack.i.bf16 %v700_v55, %v699_v56  ;;  %v419_v56 = vld [vmem:[%s4975_s1 + $0x220] sm:$0xff] }
  0xa0   : > { %v3758_v58 = vpop.permute.xlu1 %714  ;;  %v3760_v59 = vpop.permute.xlu0 %709 }
  0xa1   : > { %5071 = vst [vmem:[#allocation10_spill] sm:$0xff] %v3758_v58  ;;  %5072 = vst [vmem:[#allocation11_spill] sm:$0xff] %v3760_v59  ;;  %v748_v60 = vmul.f32 %v3758_v58, %v3756_v3  ;;  %v747_v61 = vmul.f32 %v3760_v59, %v3713_v32  ;;  %2937 = vrot.lane.b32.xlu0 %v2936_v57, %s3354_s29 }
  0xa3   : > { %v2941_v62 = vpack.i.bf16 %v748_v60, %v747_v61 }
  0xa4   : > { %v3770_v0 = vpop.permute.xlu1 %762  ;;  %v3772_v1 = vpop.permute.xlu0 %757 }
  0xa5   : > { %v796_v5 = vmul.f32 %v3770_v0, %v3693_v24  ;;  %v795_v6 = vmul.f32 %v3772_v1, %v3634_v4  ;;  %2942 = vrot.lane.b32.xlu1 %v2941_v62, %s3355_s30 }
  0xa7   : > { %v2946_v8 = vpack.i.bf16 %v796_v5, %v795_v6  ;;  %v420_v6 = vld [vmem:[%s4975_s1 + $0x228] sm:$0xff] }
  0xa8   : > { %v3780_v9 = vpop.permute.xlu1 %515  ;;  %v3782_v10 = vpop.permute.xlu0 %510 }
  0xa9   : > { %v541_v11 = vmul.f32 %v3780_v9, %v3693_v24  ;;  %v540_v12 = vmul.f32 %v3782_v10, %v3634_v4  ;;  %2947 = vrot.lane.b32.xlu0 %v2946_v8, %s3356_s11  ;;  %v3839_v24 = vsel %vm441_vm1, %v434_v14, %v435_v40  ;;  %v3857_v8 = vld [vmem:[%s3550_s19 + $0x28] sm:$0xff] }
  0xab   : > { %v2951_v15 = vpack.i.bf16 %v541_v11, %v540_v12 }
  0xac   : > { %v3797_v19 = vpop.permute.xlu1 %580  ;;  %v3799_v22 = vpop.permute.xlu0 %575 }
  0xad   : > { %v606_v23 = vmul.f32 %v3797_v19, %v3791_v13  ;;  %v605_v4 = vmul.f32 %v3799_v22, %v3738_v45  ;;  %2952 = vrot.lane.b32.xlu1 %v2951_v15, %s3352_s25 }
  0xaf   : > { %v2956_v29 = vpack.i.bf16 %v606_v23, %v605_v4  ;;  %v365_v23 = vld [vmem:[%s4975_s1 + $0x30] sm:$0xff]  ;;  %v551_v4 = vrot.slane %v3857_v8, 1 }
  0xb0   : > { %v3811_v30 = vpop.permute.xlu1 %628  ;;  %v3813_v31 = vpop.permute.xlu0 %623 }
  0xb1   : > { %5073 = vst [vmem:[#allocation12_spill] sm:$0xff] %v3811_v30  ;;  %5074 = vst [vmem:[#allocation13_spill] sm:$0xff] %v3813_v31  ;;  %v654_v34 = vmul.f32 %v3811_v30, %v3808_v27  ;;  %v653_v35 = vmul.f32 %v3813_v31, %v3756_v3  ;;  %2957 = vrot.lane.b32.xlu0 %v2956_v29, %s3351_s24 }
  0xb3   : > { %v2966_v44 = vpack.i.bf16 %v654_v34, %v653_v35 }
  0xb4   : > { %v3827_v46 = vpop.permute.xlu1 %676  ;;  %v3829_v49 = vpop.permute.xlu0 %671 }
  0xb5   : > { %5075 = vst [vmem:[#allocation14_spill] sm:$0xff] %v3827_v46  ;;  %5076 = vst [vmem:[#allocation15_spill] sm:$0xff] %v3829_v49  ;;  %v702_v54 = vmul.f32 %v3827_v46, %v3824_v39  ;;  %v701_v55 = vmul.f32 %v3829_v49, %v3791_v13  ;;  %2967 = vrot.lane.b32.xlu1 %v2966_v44, %s3353_s28  ;;  %2962 = vrot.lane.b32.xlu0 %v2961_v36, %s3350_s20 }
  0xb7   : > { %v2971_v57 = vpack.i.bf16 %v702_v54, %v701_v55  ;;  %v3883_v54 = vsel %vm554_vm0, %v550_v28, %v551_v4  ;;  %v366_v55 = vld [vmem:[%s4975_s1 + $0x38] sm:$0xff] }
  0xb8   : > { %v3844_v60 = vpop.permute.xlu1 %724  ;;  %v3846_v61 = vpop.permute.xlu0 %719 }
  0xb9   : > { %5077 = vst [vmem:[#allocation16_spill] sm:$0xff] %v3844_v60  ;;  %5078 = vst [vmem:[#allocation17_spill] sm:$0xff] %v3846_v61  ;;  %v750_v62 = vmul.f32 %v3844_v60, %v3839_v24  ;;  %v749_v5 = vmul.f32 %v3846_v61, %v3808_v27  ;;  %2972 = vrot.lane.b32.xlu1 %v2971_v57, %s3354_s29  ;;  %825 = vperm.xlu0 %2914, %v419_v56   ;;  %v436_v56 = vrot.slane %v3857_v8, 7 }
  0xbb   : > { %v2976_v7 = vpack.i.bf16 %v750_v62, %v749_v5  ;;  %v3900_v28 = vsel %vm441_vm1, %v435_v40, %v436_v56  ;;  %v3917_v40 = vsel %vm554_vm0, %v551_v4, %v552_v47  ;;  %v3933_v47 = vsel %vm441_vm1, %v436_v56, %v437_v52  ;;  %v422_v52 = vld [vmem:[%s4975_s1 + $0x238] sm:$0xff] }
  0xbc   : > { %v3859_v11 = vpop.permute.xlu1 %772  ;;  %v3861_v12 = vpop.permute.xlu0 %767 }
  0xbd   : > { %5079 = vst [vmem:[#allocation18_spill] sm:$0xff] %v3859_v11  ;;  %5080 = vst [vmem:[#allocation19_spill] sm:$0xff] %v3861_v12  ;;  %v798_v14 = vmul.f32 %v3859_v11, %v3795_v16  ;;  %v797_v15 = vmul.f32 %v3861_v12, %v3768_v63  ;;  %830 = vperm.xlu1 %2915, %v420_v6   ;;  %2977 = vrot.lane.b32.xlu0 %v2976_v7, %s3355_s30 }
  0xbf   : > { %v2981_v29 = vpack.i.bf16 %v798_v14, %v797_v15 }
  0xc0   : > { %v3872_v34 = vpop.permute.xlu1 %525  ;;  %v3874_v35 = vpop.permute.xlu0 %520 }
  0xc1   : > { %5081 = vst [vmem:[#allocation20_spill] sm:$0xff] %v3872_v34  ;;  %5082 = vst [vmem:[#allocation21_spill] sm:$0xff] %v3874_v35  ;;  %v543_v36 = vmul.f32 %v3872_v34, %v3795_v16  ;;  %v542_v44 = vmul.f32 %v3874_v35, %v3768_v63  ;;  %2982 = vrot.lane.b32.xlu1 %v2981_v29, %s3356_s11  ;;  %482 = vperm.xlu0 %2914, %v365_v23  }
  0xc3   : > { %v2986_v57 = vpack.i.bf16 %v543_v36, %v542_v44  ;;  %v3001_v36 = vpack.i.bf16 %v3857_v8, %v3795_v16  ;;  %v421_v16 = vld [vmem:[%s4975_s1 + $0x230] sm:$0xff] }
  0xc4   : > { %v3889_v62 = vpop.permute.xlu1 %590  ;;  %v3891_v5 = vpop.permute.xlu0 %585 }
  0xc5   : > { %5083 = vst [vmem:[#allocation22_spill] sm:$0xff] %v3889_v62  ;;  %5084 = vst [vmem:[#allocation23_spill] sm:$0xff] %v3891_v5  ;;  %v608_v63 = vmul.f32 %v3889_v62, %v3883_v54  ;;  %v607_v6 = vmul.f32 %v3891_v5, %v3824_v39  ;;  %487 = vperm.xlu1 %2915, %v366_v55   ;;  %2987 = vrot.lane.b32.xlu0 %v2986_v57, %s3352_s25 }
  0xc7   : > { %v2991_v7 = vpack.i.bf16 %v608_v63, %v607_v6 }
  0xc8   : > { %v3902_v14 = vpop.permute.xlu1 %638  ;;  %v3904_v15 = vpop.permute.xlu0 %633 }
  0xc9   : > { %5085 = vst [vmem:[#allocation24_spill] sm:$0xff] %v3902_v14  ;;  %5086 = vst [vmem:[#allocation25_spill] sm:$0xff] %v3904_v15  ;;  %v656_v23 = vmul.f32 %v3902_v14, %v3900_v28  ;;  %v655_v29 = vmul.f32 %v3904_v15, %v3839_v24  ;;  %2992 = vrot.lane.b32.xlu1 %v2991_v7, %s3351_s24 }
  0xcb   : > { %v2996_v44 = vpack.i.bf16 %v656_v23, %v655_v29 }
  0xcc   : > { %v3919_v55 = vpop.permute.xlu1 %686  ;;  %v3921_v57 = vpop.permute.xlu0 %681 }
  0xcd   : > { %5087 = vst [vmem:[#allocation26_spill] sm:$0xff] %v3919_v55  ;;  %5088 = vst [vmem:[#allocation27_spill] sm:$0xff] %v3921_v57  ;;  %v704_v63 = vmul.f32 %v3919_v55, %v3917_v40  ;;  %v703_v6 = vmul.f32 %v3921_v57, %v3883_v54  ;;  %3002 = vrot.lane.b32.xlu1 %v3001_v36, %s3350_s20  ;;  %2997 = vrot.lane.b32.xlu0 %v2996_v44, %s3353_s28 }
  0xcf   : > { %v3006_v4 = vpack.i.bf16 %v704_v63, %v703_v6 }
  0xd0   : > { %v3938_v7 = vpop.permute.xlu1 %734  ;;  %v3940_v23 = vpop.permute.xlu0 %729 }
  0xd1   : > { %5089 = vst [vmem:[#allocation28_spill] sm:$0xff] %v3938_v7  ;;  %5090 = vst [vmem:[#allocation29_spill] sm:$0xff] %v3940_v23  ;;  %v752_v29 = vmul.f32 %v3938_v7, %v3933_v47  ;;  %v751_v36 = vmul.f32 %v3940_v23, %v3900_v28  ;;  %835 = vperm.xlu1 %2915, %v421_v16   ;;  %3007 = vrot.lane.b32.xlu0 %v3006_v4, %s3354_s29 }
  0xd3   : > { %v3011_v56 = vpack.i.bf16 %v752_v29, %v751_v36 }
  0xd4   : > { %v3950_v44 = vpop.permute.xlu1 %782  ;;  %v3952_v63 = vpop.permute.xlu0 %777 }
  0xd5   : > { %5091 = vst [vmem:[#allocation30_spill] sm:$0xff] %v3950_v44  ;;  %5092 = vst [vmem:[#allocation31_spill] sm:$0xff] %v3952_v63  ;;  %v800_v6 = vmul.f32 %v3950_v44, %v3558_v43  ;;  %v799_v15 = vmul.f32 %v3952_v63, %v3857_v8  ;;  %3012 = vrot.lane.b32.xlu1 %v3011_v56, %s3355_s30  ;;  %840 = vperm.xlu0 %2914, %v422_v52  }
  0xd7   : > { %v3016_v16 = vpack.i.bf16 %v800_v6, %v799_v15 }
  0xd8   : > { %v3959_v4 = vpop.permute.xlu1 %535  ;;  %v3961_v14 = vpop.permute.xlu0 %530 }
  0xd9   : > { %5093 = vst [vmem:[#allocation32_spill] sm:$0xff] %v3959_v4  ;;  %5094 = vst [vmem:[#allocation33_spill] sm:$0xff] %v3961_v14  ;;  %v545_v29 = vmul.f32 %v3959_v4, %v3558_v43  ;;  %v544_v36 = vmul.f32 %v3961_v14, %v3857_v8  ;;  %3017 = vrot.lane.b32.xlu0 %v3016_v16, %s3356_s11 }
  0xdb   : > { %v3021_v5 = vpack.i.bf16 %v545_v29, %v544_v36  ;;  %v3036_v29 = vpack.i.bf16 %v3555_v42, %v3558_v43 }
  0xdc   : > { %v3968_v62 = vpop.permute.xlu1 %600  ;;  %v3970_v35 = vpop.permute.xlu0 %595 }
  0xdd   : > { %5095 = vst [vmem:[#allocation34_spill] sm:$0xff] %v3968_v62  ;;  %5096 = vst [vmem:[#allocation35_spill] sm:$0xff] %v3970_v35  ;;  %v610_v15 = vmul.f32 %v3968_v62, %v3575_v48  ;;  %v609_v52 = vmul.f32 %v3970_v35, %v3917_v40  ;;  %3022 = vrot.lane.b32.xlu1 %v3021_v5, %s3352_s25 }
  0xdf   : > { %v3026_v56 = vpack.i.bf16 %v610_v15, %v609_v52 }
  0xe0   : > { %v3977_v6 = vpop.permute.xlu1 %648  ;;  %v3979_v4 = vpop.permute.xlu0 %643 }
  0xe1   : > { %5097 = vst [vmem:[#allocation36_spill] sm:$0xff] %v3977_v6  ;;  %5098 = vst [vmem:[#allocation37_spill] sm:$0xff] %v3979_v4  ;;  %v658_v8 = vmul.f32 %v3977_v6, %v3592_v53  ;;  %v657_v16 = vmul.f32 %v3979_v4, %v3933_v47  ;;  %3027 = vrot.lane.b32.xlu0 %v3026_v56, %s3351_s24 }
  0xe3   : > { %v3031_v36 = vpack.i.bf16 %v658_v8, %v657_v16 }
  0xe4   : > { %v3988_v35 = vpop.permute.xlu1 %696  ;;  %v3990_v5 = vpop.permute.xlu0 %691 }
  0xe5   : > { %5099 = vst [vmem:[#allocation38_spill] sm:$0xff] %v3988_v35  ;;  %5100 = vst [vmem:[#allocation39_spill] sm:$0xff] %v3990_v5  ;;  %v706_v15 = vmul.f32 %v3988_v35, %v3684_v20  ;;  %v705_v52 = vmul.f32 %v3990_v5, %v3575_v48  ;;  %3032 = vrot.lane.b32.xlu1 %v3031_v36, %s3353_s28  ;;  %3037 = vrot.lane.b32.xlu0 %v3036_v29, %s3350_s20 }
  0xe7   : > { %v3041_v4 = vpack.i.bf16 %v706_v15, %v705_v52 }
  0xe8   : > { %v3998_v56 = vpop.permute.xlu1 %744  ;;  %v4000_v6 = vpop.permute.xlu0 %739 }
  0xe9   : > { %5101 = vst [vmem:[#allocation40_spill] sm:$0xff] %v3998_v56  ;;  %5102 = vst [vmem:[#allocation41_spill] sm:$0xff] %v4000_v6  ;;  %v754_v43 = vmul.f32 %v3998_v56, %v3719_v33  ;;  %v753_v8 = vmul.f32 %v4000_v6, %v3592_v53  ;;  %3042 = vrot.lane.b32.xlu1 %v3041_v4, %s3354_s29 }
  0xeb   : > { %v3046_v16 = vpack.i.bf16 %v754_v43, %v753_v8 }
  0xec   : > { %v4007_v62 = vpop.permute.xlu1 %792  ;;  %v4009_v14 = vpop.permute.xlu0 %787 }
  0xed   : > { %5103 = vst [vmem:[#allocation42_spill] sm:$0xff] %v4007_v62  ;;  %5104 = vst [vmem:[#allocation43_spill] sm:$0xff] %v4009_v14  ;;  %v802_v29 = vmul.f32 %v4007_v62, %v3631_v2  ;;  %v801_v36 = vmul.f32 %v4009_v14, %v3555_v42  ;;  %3047 = vrot.lane.b32.xlu0 %v3046_v16, %s3355_s30 }
  0xef   : > { %v3051_v15 = vpack.i.bf16 %v802_v29, %v801_v36 }
  0xf0   : > { %v4016_v52 = vpop.permute.xlu1 %457  ;;  %v4018_v56 = vpop.permute.xlu0 %452 }
  0xf1   : > { %5105 = vst [vmem:[#allocation44_spill] sm:$0xff] %v4016_v52  ;;  %5106 = vst [vmem:[#allocation45_spill] sm:$0xff] %v4018_v56  ;;  %3052 = vrot.lane.b32.xlu1 %v3051_v15, %s3356_s11 }
  0xf4   : > { %v4021_v4 = vpop.permute.xlu1 %810  ;;  %v4023_v43 = vpop.permute.xlu0 %805 }
  0xf5   : > { %v843_v8 = vmul.f32 %v4023_v43, %v3738_v45  ;;  %v844_v2 = vmul.f32 %v4021_v4, %v3791_v13 }
  0xf7   : > { %v1139_v42 = vpack.c.bf16 %v844_v2, %v843_v8  ;;  %v491_v2 = vmul.f32 %v4016_v52, %v3719_v33 }
  0xf8   : > { %v4030_v16 = vpop.permute.xlu1 %467  ;;  %v4032_v29 = vpop.permute.xlu0 %462 }
  0xf9   : > { %2729 = vmatprep.mubr.msk.bf16.mxu0 %vm1075_vm2, %v1139_v42  ;;  %5107 = vst [vmem:[#allocation46_spill] sm:$0xff] %v4030_v16  ;;  %v490_v42 = vmul.f32 %v4018_v56, %v3592_v53 }
  0xfc   : > { %v2918_v36 = vpop.permute.xlu1 %2917  ;;  %v4034_v15 = vpop.permute.xlu0 %820 }
  0xfd   : > { %5108 = vst [vmem:[#allocation47_spill] sm:$0xff] %v4034_v15  ;;  %v2920_v17 = vunpack.i.h.bf16 %v2918_v36 }
 0x100   : > { %v4036_v62 = vpop.permute.xlu1 %815  ;;  %v4038_v14 = vpop.permute.xlu0 %477 }
 0x101   : > { %5109 = vst [vmem:[#allocation48_spill] sm:$0xff] %v4036_v62 }
 0x104   : > { %v4040_v45 = vpop.permute.xlu1 %472 }
 0x10b   : > { %v2923_v6 = vpop.permute.xlu0 %2922  ;;  %v2928_v13 = vpop.permute.xlu1 %2927 }
 0x10c   : > { %v2925_v5 = vunpack.i.h.bf16 %v2923_v6  ;;  %v2924_v8 = vunpack.i.l.bf16 %v2923_v6  ;;  %v2930_v34 = vunpack.i.h.bf16 %v2928_v13  ;;  %v2929_v63 = vunpack.i.l.bf16 %v2928_v13 }
 0x10d   : > { %v2919_v6 = vunpack.i.l.bf16 %v2918_v36 }
 0x10e   : > { %v1076_v37 = vsel %vm1075_vm2, %v490_v42, %v2924_v8  ;;  %v1077_v44 = vsel %vm1075_vm2, %v491_v2, %v2925_v5 }
 0x10f   : > { %v2933_v35 = vpop.permute.xlu0 %2932  ;;  %v1085_v25 = vsel %vm1084_vm3, %v1076_v37, %v2929_v63  ;;  %v1086_v33 = vsel %vm1084_vm3, %v1077_v44, %v2930_v34 }
 0x110   : > { %v2935_v38 = vunpack.i.h.bf16 %v2933_v35  ;;  %v2934_v23 = vunpack.i.l.bf16 %v2933_v35  ;;  %v845_v35 = vmul.f32 %v4036_v62, %v3824_v39 }
 0x112   : > { %v1095_v53 = vsel %vm1093_vm4, %v1086_v33, %v2935_v38  ;;  %v1094_v13 = vsel %vm1093_vm4, %v1085_v25, %v2934_v23 }
 0x113   : > { %v2938_v7 = vpop.permute.xlu0 %2937  ;;  %v1103_v36 = vsel %vm1102_vm5, %v1094_v13, %v2919_v6  ;;  %v1104_v37 = vsel %vm1102_vm5, %v1095_v53, %v2920_v17 }
 0x114   : > { %v2940_v56 = vunpack.i.h.bf16 %v2938_v7  ;;  %v2939_v8 = vunpack.i.l.bf16 %v2938_v7 }
 0x116   : > { %v1112_v34 = vsel %vm1111_vm6, %v1103_v36, %v2939_v8  ;;  %v1113_v38 = vsel %vm1111_vm6, %v1104_v37, %v2940_v56 }
 0x117   : > { %v2943_v52 = vpop.permute.xlu1 %2942 }
 0x118   : > { %v2945_v5 = vunpack.i.h.bf16 %v2943_v52  ;;  %v2944_v2 = vunpack.i.l.bf16 %v2943_v52  ;;  %v846_v52 = vmul.f32 %v4034_v15, %v3883_v54 }
 0x11a   : > { %v1121_v7 = vsel %vm1120_vm7, %v1112_v34, %v2944_v2  ;;  %v1122_v44 = vsel %vm1120_vm7, %v1113_v38, %v2945_v5  ;;  %v1141_v6 = vpack.c.bf16 %v846_v52, %v845_v35  ;;  %v492_v5 = vmul.f32 %v4032_v29, %v3713_v32 }
 0x11b   : > { %v2948_v63 = vpop.permute.xlu0 %2947  ;;  %v493_v35 = vmul.f32 %v4030_v16, %v3756_v3 }
 0x11c   : > { %v2950_v25 = vunpack.i.h.bf16 %v2948_v63  ;;  %v2949_v23 = vunpack.i.l.bf16 %v2948_v63 }
 0x11e   : > { %v1130_v39 = vsel %vm1129_vm8, %v1121_v7, %v2949_v23  ;;  %v1131_v42 = vsel %vm1129_vm8, %v1122_v44, %v2950_v25 }
 0x11f   : > { %v1138_v17 = vpack.c.bf16 %v1131_v42, %v1130_v39  ;;  %v2953_v33 = vpop.permute.xlu1 %2952 }
 0x120   : > { %v2954_v8 = vunpack.i.l.bf16 %v2953_v33  ;;  %v2955_v2 = vunpack.i.h.bf16 %v2953_v33 }
 0x121   : > { %1270 = vmatmul.mubr.bf16.vlgmr.msra.gmra.mrb[0].mxu0 %v1138_v17 }
 0x122   : > { %2730 = vmatprep.mubr.msk.bf16.mxu0 %vm1075_vm2, %v1141_v6  ;;  %v1078_v25 = vsel %vm1075_vm2, %v492_v5, %v2954_v8  ;;  %v1079_v23 = vsel %vm1075_vm2, %v493_v35, %v2955_v2 }
 0x123   : > { %v2958_v56 = vpop.permute.xlu0 %2957 }
 0x124   : > { %v2959_v36 = vunpack.i.l.bf16 %v2958_v56  ;;  %v2960_v54 = vunpack.i.h.bf16 %v2958_v56 }
 0x126   : > { %v1087_v7 = vsel %vm1084_vm3, %v1078_v25, %v2959_v36  ;;  %v1088_v52 = vsel %vm1084_vm3, %v1079_v23, %v2960_v54 }
 0x127   : > { %v2968_v53 = vpop.permute.xlu1 %2967  ;;  %v2963_v13 = vpop.permute.xlu0 %2962 }
 0x128   : > { %v2969_v37 = vunpack.i.l.bf16 %v2968_v53  ;;  %v2970_v38 = vunpack.i.h.bf16 %v2968_v53  ;;  %v2964_v44 = vunpack.i.l.bf16 %v2963_v13  ;;  %v2965_v39 = vunpack.i.h.bf16 %v2963_v13 }
 0x12a   : > { %v1096_v32 = vsel %vm1093_vm4, %v1087_v7, %v2969_v37  ;;  %v1097_v33 = vsel %vm1093_vm4, %v1088_v52, %v2970_v38 }
 0x12b   : > { %v2973_v63 = vpop.permute.xlu1 %2972  ;;  %v1105_v8 = vsel %vm1102_vm5, %v1096_v32, %v2964_v44  ;;  %v1106_v2 = vsel %vm1102_vm5, %v1097_v33, %v2965_v39 }
 0x12c   : > { %v2974_v42 = vunpack.i.l.bf16 %v2973_v63  ;;  %v2975_v3 = vunpack.i.h.bf16 %v2973_v63 }
 0x12e   : > { %v1114_v36 = vsel %vm1111_vm6, %v1105_v8, %v2974_v42  ;;  %v1115_v13 = vsel %vm1111_vm6, %v1106_v2, %v2975_v3  ;;  %v495_v2 = vmul.f32 %v4038_v14, %v3839_v24 }
 0x138   : > { %v4067_v34 = vpop.permute.xlu0 %825 }
 0x139   : > { %5110 = vst [vmem:[#allocation49_spill] sm:$0xff] %v4067_v34  ;;  %v847_v23 = vmul.f32 %v4067_v34, %v3917_v40  ;;  %v494_v40 = vmul.f32 %v4040_v45, %v3808_v27 }
 0x13c   : > { %v4076_v17 = vpop.permute.xlu1 %830  ;;  %v2978_v6 = vpop.permute.xlu0 %2977 }
 0x13d   : > { %5111 = vst [vmem:[#allocation50_spill] sm:$0xff] %v4076_v17  ;;  %v2980_v56 = vunpack.i.h.bf16 %v2978_v6  ;;  %v2979_v53 = vunpack.i.l.bf16 %v2978_v6  ;;  %v848_v37 = vmul.f32 %v4076_v17, %v3575_v48 }
 0x13f   : > { %v1123_v63 = vsel %vm1120_vm7, %v1114_v36, %v2979_v53  ;;  %v1124_v38 = vsel %vm1120_vm7, %v1115_v13, %v2980_v56  ;;  %v1143_v42 = vpack.c.bf16 %v848_v37, %v847_v23 }
 0x140   : > { %v2983_v5 = vpop.permute.xlu1 %2982  ;;  %v4082_v54 = vpop.permute.xlu0 %482 }
 0x141   : > { %v2985_v35 = vunpack.i.h.bf16 %v2983_v5  ;;  %v2984_v25 = vunpack.i.l.bf16 %v2983_v5 }
 0x143   : > { %v1132_v7 = vsel %vm1129_vm8, %v1123_v63, %v2984_v25  ;;  %v1133_v44 = vsel %vm1129_vm8, %v1124_v38, %v2985_v35 }
 0x144   : > { %v4093_v52 = vpop.permute.xlu1 %487  ;;  %v2988_v32 = vpop.permute.xlu0 %2987  ;;  %v1140_v39 = vpack.c.bf16 %v1133_v44, %v1132_v7 }
 0x145   : > { %v2989_v33 = vunpack.i.l.bf16 %v2988_v32  ;;  %v2990_v56 = vunpack.i.h.bf16 %v2988_v32 }
 0x146   : > { %1278 = vmatmul.mubr.bf16.gmra.mrb[4].mxu0 %v1140_v39 }
 0x147   : > { %2731 = vmatprep.mubr.msk.bf16.mxu0 %vm1075_vm2, %v1143_v42  ;;  %v1080_v36 = vsel %vm1075_vm2, %v494_v40, %v2989_v33  ;;  %v1081_v35 = vsel %vm1075_vm2, %v495_v2, %v2990_v56 }
 0x148   : > { %v2993_v48 = vpop.permute.xlu1 %2992  ;;  %v2998_v6 = vpop.permute.xlu0 %2997 }
 0x149   : > { %v2994_v53 = vunpack.i.l.bf16 %v2993_v48  ;;  %v2995_v8 = vunpack.i.h.bf16 %v2993_v48  ;;  %v2999_v5 = vunpack.i.l.bf16 %v2998_v6  ;;  %v3000_v63 = vunpack.i.h.bf16 %v2998_v6 }
 0x14b   : > { %v1089_v25 = vsel %vm1084_vm3, %v1080_v36, %v2994_v53  ;;  %v1090_v23 = vsel %vm1084_vm3, %v1081_v35, %v2995_v8 }
 0x14c   : > { %v3003_v3 = vpop.permute.xlu1 %3002  ;;  %v3008_v13 = vpop.permute.xlu0 %3007  ;;  %v1098_v27 = vsel %vm1093_vm4, %v1089_v25, %v2999_v5  ;;  %v1099_v39 = vsel %vm1093_vm4, %v1090_v23, %v3000_v63 }
 0x14d   : > { %v3004_v38 = vunpack.i.l.bf16 %v3003_v3  ;;  %v3005_v7 = vunpack.i.h.bf16 %v3003_v3  ;;  %v3009_v44 = vunpack.i.l.bf16 %v3008_v13  ;;  %v3010_v48 = vunpack.i.h.bf16 %v3008_v13 }
 0x14f   : > { %v1107_v42 = vsel %vm1102_vm5, %v1098_v27, %v3004_v38  ;;  %v1108_v33 = vsel %vm1102_vm5, %v1099_v39, %v3005_v7  ;;  %v496_v27 = vmul.f32 %v4082_v54, %v3900_v28 }
 0x150   : > { %v4101_v37 = vpop.permute.xlu1 %835  ;;  %v1116_v6 = vsel %vm1111_vm6, %v1107_v42, %v3009_v44  ;;  %v1117_v3 = vsel %vm1111_vm6, %v1108_v33, %v3010_v48 }
 0x151   : > { %5112 = vst [vmem:[#allocation51_spill] sm:$0xff] %v4101_v37  ;;  %v849_v38 = vmul.f32 %v4101_v37, %v3684_v20 }
 0x154   : > { %v3013_v32 = vpop.permute.xlu1 %3012  ;;  %v4107_v24 = vpop.permute.xlu0 %840 }
 0x155   : > { %v3015_v56 = vunpack.i.h.bf16 %v3013_v32  ;;  %v3014_v53 = vunpack.i.l.bf16 %v3013_v32  ;;  %v850_v2 = vmul.f32 %v4107_v24, %v3688_v21  ;;  %v497_v21 = vmul.f32 %v4093_v52, %v3933_v47 }
 0x157   : > { %v1125_v35 = vsel %vm1120_vm7, %v1116_v6, %v3014_v53  ;;  %v1126_v25 = vsel %vm1120_vm7, %v1117_v3, %v3015_v56  ;;  %v1145_v42 = vpack.c.bf16 %v850_v2, %v849_v38 }
 0x158   : > { %v3023_v40 = vpop.permute.xlu1 %3022  ;;  %v3018_v8 = vpop.permute.xlu0 %3017 }
 0x159   : > { %v3020_v36 = vunpack.i.h.bf16 %v3018_v8  ;;  %v3019_v5 = vunpack.i.l.bf16 %v3018_v8  ;;  %v3025_v13 = vunpack.i.h.bf16 %v3023_v40  ;;  %v3024_v63 = vunpack.i.l.bf16 %v3023_v40 }
 0x15b   : > { %v1134_v23 = vsel %vm1129_vm8, %v1125_v35, %v3019_v5  ;;  %v1135_v7 = vsel %vm1129_vm8, %v1126_v25, %v3020_v36  ;;  %v1083_v56 = vsel %vm1075_vm2, %v497_v21, %v3025_v13  ;;  %v1082_v20 = vsel %vm1075_vm2, %v496_v27, %v3024_v63 }
 0x15c   : > { %v3033_v44 = vpop.permute.xlu1 %3032  ;;  %v3028_v32 = vpop.permute.xlu0 %3027  ;;  %v1142_v39 = vpack.c.bf16 %v1135_v7, %v1134_v23 }
 0x15d   : > { %v3030_v48 = vunpack.i.h.bf16 %v3028_v32  ;;  %v3029_v33 = vunpack.i.l.bf16 %v3028_v32  ;;  %v3035_v53 = vunpack.i.h.bf16 %v3033_v44  ;;  %v3034_v6 = vunpack.i.l.bf16 %v3033_v44 }
 0x15e   : > { %1286 = vmatmul.mubr.bf16.gmra.mrb[8].mxu0 %v1142_v39 }
 0x15f   : > { %v1092_v40 = vsel %vm1084_vm3, %v1083_v56, %v3030_v48  ;;  %v1091_v28 = vsel %vm1084_vm3, %v1082_v20, %v3029_v33  ;;  %2732 = vmatprep.mubr.msk.bf16.mxu0 %vm1075_vm2, %v1145_v42 }
 0x160   : > { %v3043_v47 = vpop.permute.xlu1 %3042  ;;  %v3038_v8 = vpop.permute.xlu0 %3037  ;;  %v1100_v35 = vsel %vm1093_vm4, %v1091_v28, %v3034_v6  ;;  %v1101_v25 = vsel %vm1093_vm4, %v1092_v40, %v3035_v53 }
 0x161   : > { %v3040_v3 = vunpack.i.h.bf16 %v3038_v8  ;;  %v3039_v36 = vunpack.i.l.bf16 %v3038_v8  ;;  %v3045_v2 = vunpack.i.h.bf16 %v3043_v47  ;;  %v3044_v5 = vunpack.i.l.bf16 %v3043_v47  ;;  %v4144_v47 = vld [vmem:[%s4977_s3] ss:$0 sm:$0xff] }
 0x163   : > { %v1109_v13 = vsel %vm1102_vm5, %v1100_v35, %v3039_v36  ;;  %v1110_v63 = vsel %vm1102_vm5, %v1101_v25, %v3040_v3 }
 0x164   : > { %v3053_v38 = vpop.permute.xlu1 %3052  ;;  %v3048_v23 = vpop.permute.xlu0 %3047  ;;  %v1118_v32 = vsel %vm1111_vm6, %v1109_v13, %v3044_v5  ;;  %v1119_v39 = vsel %vm1111_vm6, %v1110_v63, %v3045_v2 }
 0x165   : > { %v3055_v7 = vunpack.i.h.bf16 %v3053_v38  ;;  %v3054_v27 = vunpack.i.l.bf16 %v3053_v38  ;;  %v3050_v21 = vunpack.i.h.bf16 %v3048_v23  ;;  %v3049_v44 = vunpack.i.l.bf16 %v3048_v23 }
 0x167   : > { %v1127_v42 = vsel %vm1120_vm7, %v1118_v32, %v3049_v44  ;;  %v1128_v48 = vsel %vm1120_vm7, %v1119_v39, %v3050_v21 }
 0x168   : > { %v1136_v33 = vsel %vm1129_vm8, %v1127_v42, %v3054_v27  ;;  %v1137_v56 = vsel %vm1129_vm8, %v1128_v48, %v3055_v7 }
 0x169   : > { %v1144_v20 = vpack.c.bf16 %v1137_v56, %v1136_v33 }
 0x16b   : > { %1294 = vmatmul.mubr.bf16.gmra.mrb[12].mxu0 %v1144_v20 }
 0x1f4   : > { %v1271_v53 = vpop.f32.mrb[0].mxu0 }
 0x1f5   : > { %v1273_v6 = vpop.f32.mrb[1].mxu0  ;;  %v1272_v3 = vadd.f32 %v4144_v47, %v1271_v53 }
 0x1f6   : > { %v1274_v40 = vpop.f32.mrb[2].mxu0 }
 0x1f7   : > { %v1276_v28 = vpop.f32.mrb[3].mxu0  ;;  %v1275_v8 = vadd.f32 %v4144_v47, %v1274_v40  ;;  %v4150_v2 = vmax.f32 %v1272_v3, 0.0 }
 0x1f9   : > { %v4148_v36 = vmax.f32 %v1275_v8, 0.0  ;;  %v5042_v38 = vrot.slane %v4150_v2, 1  ;;  %v5041_v20 = vrot.slane %v4150_v2, 7 }
 0x1fb   : > { %v1343_v35 = vrot.slane %v4148_v36, 1  ;;  %v1390_v21 = vmul.f32 %v4148_v36, %v3772_v1  ;;  %v1336_v44 = vmul.f32 %v4148_v36, %v3782_v10  ;;  %v1311_v39 = vrot.slane %v4148_v36, 7 }
 0x1fd   : > { %v4166_v32 = vsel %vm554_vm0, %v5042_v38, %v1343_v35 }
 0x1fe   : > { %v1374_v3 = vmul.f32 %v4166_v32, %v3744_v51  ;;  %v5126_v51 = vld [vmem:[#allocation21_spill] sm:$0xff] }
 0x219   : > { %v1279_v5 = vpop.f32.mrb[4].mxu0 }
 0x21a   : > { %v1280_v25 = vadd.f32 %v4144_v47, %v1279_v5  ;;  %v1281_v13 = vpop.f32.mrb[5].mxu0 }
 0x21b   : > { %v1282_v63 = vpop.f32.mrb[6].mxu0 }
 0x21c   : > { %v4155_v23 = vmax.f32 %v1280_v25, 0.0  ;;  %v1283_v7 = vadd.f32 %v4144_v47, %v1282_v63  ;;  %v1284_v27 = vpop.f32.mrb[7].mxu0  ;;  %v4197_v63 = vsel %vm441_vm1, %v5041_v20, %v1311_v39 }
 0x21e   : > { %v4169_v42 = vmax.f32 %v1283_v7, 0.0  ;;  %v1391_v48 = vmul.f32 %v4155_v23, %v3770_v0  ;;  %v1337_v33 = vmul.f32 %v4155_v23, %v3780_v9  ;;  %v1344_v56 = vrot.slane %v4155_v23, 1 }
 0x21f   : > { %v1312_v53 = vrot.slane %v4155_v23, 7 }
 0x220   : > { %v3056_v6 = vpack.i.bf16 %v1391_v48, %v1390_v21  ;;  %v3061_v40 = vpack.i.bf16 %v1337_v33, %v1336_v44  ;;  %v1355_v28 = vsel %vm554_vm0, %v1343_v35, %v1344_v56  ;;  %v1345_v8 = vrot.slane %v4169_v42, 1  ;;  %v3305_v48 = vld [vmem:[%s4978_s4 + $0x40] sm:$0xff]  }
 0x221   : > { %v1375_v5 = vmul.f32 %v1355_v28, %v3742_v50  ;;  %v4186_v25 = vsel %vm441_vm1, %v1311_v39, %v1312_v53  ;;  %v1313_v13 = vrot.slane %v4169_v42, 7  ;;  %v1360_v27 = vmul.f32 %v1355_v28, %v3799_v22  ;;  %v3306_v33 = vld [vmem:[%s4978_s4] sm:$0xff]   ;;  %v3307_v39 = vld [vmem:[%s4978_s4 + $0x48] sm:$0xff]   ;;  %2782 = vmatprep.subr.bf16.mxu1 %v3305_v48 }
 0x222   : > { %3057 = vrot.lane.b32.xlu0 %v3056_v6, %s3355_s30  ;;  %3062 = vrot.lane.b32.xlu1 %v3061_v40, %s3351_s24  ;;  %v1354_v35 = vsel %vm554_vm0, %v1344_v56, %v1345_v8  ;;  %v1383_v56 = vmul.f32 %v4186_v25, %v3758_v58  ;;  %v1382_v40 = vmul.f32 %v4197_v63, %v3760_v59  ;;  %v5115_v59 = vld [vmem:[#allocation3_spill] sm:$0xff] }
 0x223   : > { %v3066_v7 = vpack.i.bf16 %v1375_v5, %v1374_v3  ;;  %v1361_v21 = vmul.f32 %v1354_v35, %v3797_v19  ;;  %v4203_v44 = vsel %vm441_vm1, %v1312_v53, %v1313_v13  ;;  %2783 = vmatpush3.bf16.msra.mxu1 %v3306_v33  ;;  %v4222_v3 = vmul.f32 %v1355_v28, %v4023_v43  ;;  %v3308_v28 = vld [vmem:[%s4978_s4 + $0x8] sm:$0xff]   ;;  %v3309_v33 = vld [vmem:[%s4978_s4 + $0x50] sm:$0xff]  }
 0x224   : > { %v1369_v53 = vmul.f32 %v4203_v44, %v3811_v30  ;;  %v4225_v5 = vmul.f32 %v1354_v35, %v4021_v4  ;;  %2784 = vmatprep.subr.bf16.mxu1 %v3307_v39 }
 0x225   : > { %v3076_v6 = vpack.i.bf16 %v1361_v21, %v1360_v27  ;;  %v1368_v27 = vmul.f32 %v4186_v25, %v3813_v31  ;;  %v3071_v21 = vpack.i.bf16 %v1383_v56, %v1382_v40  ;;  %v5117_v31 = vrot.slane %v4150_v2, 7 }
 0x226   : > { %3067 = vrot.lane.b32.xlu0 %v3066_v7, %s3351_s24 }
 0x227   : > { %3077 = vrot.lane.b32.xlu1 %v3076_v6, %s3350_s20  ;;  %v3081_v48 = vpack.i.bf16 %v1369_v53, %v1368_v27  ;;  %2785 = vmatpush3.bf16.msra.mxu1 %v3308_v28  ;;  %v3310_v53 = vld [vmem:[%s4978_s4 + $0x10] sm:$0xff]   ;;  %v3311_v27 = vld [vmem:[%s4978_s4 + $0x58] sm:$0xff]   ;;  %v1392_v28 = vmul.f32 %v4169_v42, %v3861_v12 }
 0x228   : > { %2786 = vmatprep.subr.bf16.mxu1 %v3309_v33 }
 0x22a   : > { %3072 = vrot.lane.b32.xlu0 %v3071_v21, %s3350_s20 }
 0x22b   : > { %3082 = vrot.lane.b32.xlu1 %v3081_v48, %s3355_s30  ;;  %2787 = vmatpush3.bf16.msra.mxu1 %v3310_v53 }
 0x22c   : > { %2788 = vmatprep.subr.bf16.mxu1 %v3311_v27 }
 0x231   : > { %v1287_v39 = vpop.f32.mrb[8].mxu0 }
 0x232   : > { %v1288_v56 = vadd.f32 %v4144_v47, %v1287_v39  ;;  %v1289_v6 = vpop.f32.mrb[9].mxu0 }
 0x233   : > { %v1290_v40 = vpop.f32.mrb[10].mxu0 }
 0x234   : > { %v4247_v21 = vmax.f32 %v1288_v56, 0.0  ;;  %v1291_v48 = vadd.f32 %v4144_v47, %v1290_v40  ;;  %v1292_v7 = vpop.f32.mrb[11].mxu0  ;;  %v3312_v56 = vld [vmem:[%s4978_s4 + $0x18] sm:$0xff]  }
 0x235   : > { %v3313_v7 = vld [vmem:[%s4978_s4 + $0x60] sm:$0xff]   ;;  %2789 = vmatpush3.bf16.msra.mxu1 %v3312_v56 }
 0x236   : > { %v1314_v33 = vrot.slane %v4247_v21, 7  ;;  %v1346_v39 = vrot.slane %v4247_v21, 1  ;;  %v4254_v6 = vmax.f32 %v1291_v48, 0.0  ;;  %v1393_v20 = vmul.f32 %v4247_v21, %v3859_v11  ;;  %v3314_v11 = vld [vmem:[%s4978_s4 + $0x20] sm:$0xff]   ;;  %2790 = vmatprep.subr.bf16.mxu1 %v3313_v7 }
 0x237   : > { %v1376_v48 = vmul.f32 %v1354_v35, %v3829_v49 }
 0x238   : > { %v1347_v40 = vrot.slane %v4254_v6, 1  ;;  %v3086_v53 = vpack.i.bf16 %v1393_v20, %v1392_v28  ;;  %v4267_v38 = vsel %vm554_vm0, %v1345_v8, %v1346_v39  ;;  %v4274_v12 = vsel %vm441_vm1, %v1313_v13, %v1314_v33 }
 0x239   : > { %v1377_v27 = vmul.f32 %v4267_v38, %v3827_v46  ;;  %v4286_v8 = vmul.f32 %v4267_v38, %v4036_v62  ;;  %v1385_v28 = vmul.f32 %v4274_v12, %v3844_v60  ;;  %2791 = vmatpush3.bf16.msra.mxu1 %v3314_v11  ;;  %v3316_v60 = vld [vmem:[%s4978_s4 + $0x28] sm:$0xff]   ;;  %v5113_v62 = vrot.slane %v4150_v2, 1 }
 0x23a   : > { %3087 = vrot.lane.b32.xlu0 %v3086_v53, %s3355_s30  ;;  %v4282_v20 = vsel %vm554_vm0, %v1346_v39, %v1347_v40  ;;  %v1384_v39 = vmul.f32 %v4203_v44, %v3846_v61 }
 0x23b   : > { %v3091_v35 = vpack.i.bf16 %v1377_v27, %v1376_v48  ;;  %v4290_v13 = vmul.f32 %v4282_v20, %v4034_v15  ;;  %v3315_v48 = vld [vmem:[%s4978_s4 + $0x68] sm:$0xff]  }
 0x23c   : > { %v3096_v56 = vpack.i.bf16 %v1385_v28, %v1384_v39  ;;  %2792 = vmatprep.subr.bf16.mxu1 %v3315_v48 }
 0x23d   : > { %2793 = vmatpush3.bf16.msra.mxu1 %v3316_v60  ;;  %v3319_v60 = vld [vmem:[%s4978_s4 + $0x78] sm:$0xff]  }
 0x23e   : > { %v1295_v53 = vpop.f32.mrb[12].mxu0  ;;  %3092 = vrot.lane.b32.xlu0 %v3091_v35, %s3351_s24 }
 0x23f   : > { %v1296_v27 = vadd.f32 %v4144_v47, %v1295_v53  ;;  %v1297_v7 = vpop.f32.mrb[13].mxu0  ;;  %v3317_v53 = vld [vmem:[%s4978_s4 + $0x70] sm:$0xff]  }
 0x240   : > { %v1298_v49 = vpop.f32.mrb[14].mxu0  ;;  %v1315_v7 = vrot.slane %v4254_v6, 7  ;;  %2794 = vmatprep.subr.bf16.mxu1 %v3317_v53 }
 0x241   : > { %v4306_v11 = vmax.f32 %v1296_v27, 0.0  ;;  %v1299_v35 = vadd.f32 %v4144_v47, %v1298_v49  ;;  %v1300_v46 = vpop.f32.mrb[15].mxu0  ;;  %v3318_v49 = vld [vmem:[%s4978_s4 + $0x30] sm:$0xff]   ;;  %v1378_v27 = vmul.f32 %v4282_v20, %v3921_v57 }
 0x242   : > { %3097 = vrot.lane.b32.xlu0 %v3096_v56, %s3350_s20  ;;  %v1335_v46 = vmul.f32 %v4150_v2, %v3698_v26  ;;  %2795 = vmatpush3.bf16.msra.mxu1 %v3318_v49  ;;  %v4350_v57 = vsel %vm441_vm1, %v1314_v33, %v1315_v7 }
 0x243   : > { %v1316_v61 = vrot.slane %v4306_v11, 7  ;;  %v1348_v15 = vrot.slane %v4306_v11, 1  ;;  %v4316_v28 = vmax.f32 %v1299_v35, 0.0  ;;  %2796 = vmatprep.subr.bf16.mxu1 %v3319_v60 }
 0x245   : > { %v1317_v47 = vrot.slane %v4316_v28, 7  ;;  %v1349_v56 = vrot.slane %v4316_v28, 1  ;;  %v1334_v39 = vmul.f32 %v4316_v28, %v3675_v18  ;;  %v4332_v48 = vsel %vm554_vm0, %v1347_v40, %v1348_v15  ;;  %v5114_v40 = vld [vmem:[#allocation5_spill] sm:$0xff] }
 0x246   : > { %v1379_v35 = vmul.f32 %v4332_v48, %v3919_v55  ;;  %v4340_v53 = vsel %vm441_vm1, %v1315_v7, %v1316_v61  ;;  %v1359_v49 = vmul.f32 %v4166_v32, %v5114_v40  ;;  %v3320_v55 = vld [vmem:[%s4978_s4 + $0x38] sm:$0xff]  }
 0x247   : > { %v3101_v26 = vpack.i.bf16 %v1335_v46, %v1334_v39  ;;  %v1357_v18 = vsel %vm554_vm0, %v1349_v56, %v5113_v62  ;;  %v5116_v46 = vld [vmem:[#allocation28_spill] sm:$0xff]  ;;  %v4362_v62 = vsel %vm441_vm1, %v1317_v47, %v5117_v31  ;;  %v5118_v7 = vld [vmem:[#allocation29_spill] sm:$0xff]  ;;  %2797 = vmatpush3.bf16.msra.mxu1 %v3320_v55 }
 0x248   : > { %v3106_v58 = vpack.i.bf16 %v1379_v35, %v1378_v27  ;;  %v1358_v60 = vmul.f32 %v1357_v18, %v5115_v59  ;;  %v1387_v39 = vmul.f32 %v4340_v53, %v5116_v46  ;;  %v1386_v40 = vmul.f32 %v4350_v57, %v5118_v7  ;;  %v4371_v27 = vld [vmem:[%s4978_s4 + $0x80] sm:$0xff]   ;;  %v5119_v35 = vld [vmem:[#allocation8_spill] sm:$0xff] }
 0x249   : > { %3102 = vrot.lane.b32.xlu1 %v3101_v26, %s3351_s24  ;;  %v1366_v46 = vmul.f32 %v4362_v62, %v5119_v35  ;;  %v5120_v59 = vld [vmem:[#allocation30_spill] sm:$0xff]  ;;  %v1350_v26 = vsel %vm554_vm0, %v1348_v15, %v1349_v56  ;;  %2874 = vmatprep.subr.bf16.mxu1 %v4371_v27  ;;  %v5122_v7 = vld [vmem:[#allocation31_spill] sm:$0xff]  ;;  %v4394_v55 = vmul.f32 %v1357_v18, %v4101_v37  ;;  %v5129_v37 = vld [vmem:[#allocation40_spill] sm:$0xff] }
 0x24a   : > { %3107 = vrot.lane.b32.xlu0 %v3106_v58, %s3351_s24  ;;  %v3111_v33 = vpack.i.bf16 %v1359_v49, %v1358_v60  ;;  %v1395_v31 = vmul.f32 %v4306_v11, %v5120_v59  ;;  %v3126_v58 = vpack.i.bf16 %v1387_v39, %v1386_v40  ;;  %v5121_v49 = vld [vmem:[#allocation7_spill] sm:$0xff]  ;;  %v1394_v30 = vmul.f32 %v4254_v6, %v5122_v7  ;;  %v5125_v35 = vld [vmem:[#allocation38_spill] sm:$0xff] }
 0x24b   : > { %v1367_v60 = vmul.f32 %v4197_v63, %v5121_v49  ;;  %v4388_v59 = vmul.f32 %v4332_v48, %v4067_v34  ;;  %v4391_v15 = vmul.f32 %v1350_v26, %v4076_v17  ;;  %v4398_v56 = vmul.f32 %v4166_v32, %v4107_v24  ;;  %v5128_v17 = vld [vmem:[#allocation41_spill] sm:$0xff] }
 0x24c   : > { %v3136_v39 = vpack.i.bf16 %v1395_v31, %v1394_v30  ;;  %v1381_v34 = vmul.f32 %v1357_v18, %v5125_v35  ;;  %v1338_v32 = vmul.f32 %v4169_v42, %v5126_v51  ;;  %v4413_v30 = vsel %vm441_vm1, %v1316_v61, %v1317_v47  ;;  %v5127_v31 = vld [vmem:[#allocation22_spill] sm:$0xff]  ;;  %v5131_v47 = vld [vmem:[#allocation24_spill] sm:$0xff] }
 0x24d   : > { %3112 = vrot.lane.b32.xlu1 %v3111_v33, %s3350_s20  ;;  %v3116_v40 = vpack.i.bf16 %v1367_v60, %v1366_v46  ;;  %v5123_v33 = vld [vmem:[#allocation20_spill] sm:$0xff]  ;;  %v1363_v18 = vmul.f32 %v4282_v20, %v5127_v31  ;;  %v1388_v35 = vmul.f32 %v4413_v30, %v5128_v17  ;;  %v5132_v20 = vld [vmem:[#allocation43_spill] sm:$0xff] }
 0x24e   : > { %3127 = vrot.lane.b32.xlu0 %v3126_v58, %s3350_s20  ;;  %v1339_v7 = vmul.f32 %v4247_v21, %v5123_v33  ;;  %v5124_v58 = vld [vmem:[#allocation39_spill] sm:$0xff] }
 0x24f   : > { %v1380_v49 = vmul.f32 %v1350_v26, %v5124_v58  ;;  %v5130_v58 = vld [vmem:[#allocation23_spill] sm:$0xff] }
 0x250   : > { %v3121_v46 = vpack.i.bf16 %v1339_v7, %v1338_v32  ;;  %v1362_v51 = vmul.f32 %v4267_v38, %v5130_v58  ;;  %v1371_v7 = vmul.f32 %v4350_v57, %v5131_v47 }
 0x251   : > { %3117 = vrot.lane.b32.xlu1 %v3116_v40, %s3355_s30  ;;  %v3151_v60 = vpack.i.bf16 %v1381_v34, %v1380_v49  ;;  %v1389_v40 = vmul.f32 %v4362_v62, %v5129_v37  ;;  %v1396_v34 = vmul.f32 %v4316_v28, %v5132_v20  ;;  %v5133_v49 = vld [vmem:[#allocation25_spill] sm:$0xff]  ;;  %v5137_v20 = vld [vmem:[#allocation34_spill] sm:$0xff] }
 0x252   : > { %3137 = vrot.lane.b32.xlu0 %v3136_v39, %s3355_s30  ;;  %v3131_v61 = vpack.i.bf16 %v1363_v18, %v1362_v51  ;;  %v1370_v32 = vmul.f32 %v4274_v12, %v5133_v49  ;;  %v1365_v17 = vmul.f32 %v1350_v26, %v5137_v20 }
 0x253   : > { %v3156_v39 = vpack.i.bf16 %v1389_v40, %v1388_v35  ;;  %v5136_v35 = vld [vmem:[#allocation33_spill] sm:$0xff] }
 0x254   : > { %v3141_v37 = vpack.i.bf16 %v1371_v7, %v1370_v32  ;;  %v1340_v40 = vmul.f32 %v4254_v6, %v5136_v35  ;;  %v5139_v32 = vld [vmem:[#allocation36_spill] sm:$0xff] }
 0x255   : > { %3122 = vrot.lane.b32.xlu1 %v3121_v46, %s3351_s24  ;;  %v5134_v46 = vld [vmem:[#allocation42_spill] sm:$0xff]  ;;  %v1373_v49 = vmul.f32 %v4413_v30, %v5139_v32 }
 0x256   : > { %3152 = vrot.lane.b32.xlu0 %v3151_v60, %s3351_s24  ;;  %v1397_v38 = vmul.f32 %v4150_v2, %v5134_v46  ;;  %v5135_v60 = vld [vmem:[#allocation32_spill] sm:$0xff] }
 0x257   : > { %v1341_v51 = vmul.f32 %v4306_v11, %v5135_v60 }
 0x258   : > { %v3161_v18 = vpack.i.bf16 %v1397_v38, %v1396_v34 }
 0x259   : > { %3132 = vrot.lane.b32.xlu1 %v3131_v61, %s3350_s20  ;;  %v3146_v61 = vpack.i.bf16 %v1341_v51, %v1340_v40 }
 0x25a   : > { %3157 = vrot.lane.b32.xlu0 %v3156_v39, %s3350_s20  ;;  %v5138_v39 = vld [vmem:[#allocation35_spill] sm:$0xff] }
 0x25b   : > { %v1364_v46 = vmul.f32 %v4332_v48, %v5138_v39 }
 0x25d   : > { %3142 = vrot.lane.b32.xlu1 %v3141_v37, %s3355_s30  ;;  %v3166_v7 = vpack.i.bf16 %v1365_v17, %v1364_v46  ;;  %v5140_v37 = vld [vmem:[#allocation37_spill] sm:$0xff]  ;;  %v1328_v17 = vmul.f32 %v4197_v63, %v4032_v29  ;;  %v1329_v46 = vmul.f32 %v4186_v25, %v4030_v16 }
 0x25e   : > { %3162 = vrot.lane.b32.xlu0 %v3161_v18, %s3355_s30  ;;  %v1372_v34 = vmul.f32 %v4340_v53, %v5140_v37 }
 0x260   : > { %v3171_v38 = vpack.i.bf16 %v1373_v49, %v1372_v34 }
 0x261   : > { %3147 = vrot.lane.b32.xlu1 %v3146_v61, %s3351_s24 }
 0x265   : > { %3167 = vrot.lane.b32.xlu1 %v3166_v7, %s3350_s20 }
 0x269   : > { %3172 = vrot.lane.b32.xlu1 %v3171_v38, %s3355_s30 }
 0x294   : > { %v3058_v51 = vpop.permute.xlu0 %3057  ;;  %v3063_v18 = vpop.permute.xlu1 %3062 }
 0x295   : > { %v3065_v40 = vunpack.i.h.bf16 %v3063_v18  ;;  %v3064_v61 = vunpack.i.l.bf16 %v3063_v18  ;;  %v3060_v37 = vunpack.i.h.bf16 %v3058_v51  ;;  %v3059_v49 = vunpack.i.l.bf16 %v3058_v51 }
 0x297   : > { %v1600_v38 = vsel %vm1084_vm3, %v1328_v17, %v3064_v61  ;;  %v1601_v39 = vsel %vm1084_vm3, %v1329_v46, %v3065_v40 }
 0x298   : > { %v3068_v26 = vpop.permute.xlu0 %3067 }
 0x299   : > { %v3078_v20 = vpop.permute.xlu1 %3077  ;;  %v3070_v47 = vunpack.i.h.bf16 %v3068_v26  ;;  %v3069_v48 = vunpack.i.l.bf16 %v3068_v26 }
 0x29a   : > { %v3080_v7 = vunpack.i.h.bf16 %v3078_v20  ;;  %v3079_v32 = vunpack.i.l.bf16 %v3078_v20 }
 0x29b   : > { %v1622_v63 = vsel %vm1084_vm3, %v4150_v2, %v3069_v48  ;;  %v1623_v25 = vsel %vm1084_vm3, %v4148_v36, %v3070_v47 }
 0x29c   : > { %v3073_v34 = vpop.permute.xlu0 %3072  ;;  %v1608_v20 = vsel %vm1102_vm5, %v1600_v38, %v3079_v32  ;;  %v1609_v51 = vsel %vm1102_vm5, %v1601_v39, %v3080_v7 }
 0x29d   : > { %v3075_v58 = vunpack.i.h.bf16 %v3073_v34  ;;  %v3074_v18 = vunpack.i.l.bf16 %v3073_v34  ;;  %v3083_v31 = vpop.permute.xlu1 %3082 }
 0x29e   : > { %v3085_v60 = vunpack.i.h.bf16 %v3083_v31  ;;  %v3084_v26 = vunpack.i.l.bf16 %v3083_v31 }
 0x29f   : > { %v1630_v16 = vsel %vm1102_vm5, %v1622_v63, %v3074_v18  ;;  %v1631_v61 = vsel %vm1102_vm5, %v1623_v25, %v3075_v58 }
 0x2a0   : > { %v1638_v40 = vsel %vm1120_vm7, %v1630_v16, %v3059_v49  ;;  %v1639_v17 = vsel %vm1120_vm7, %v1631_v61, %v3060_v37  ;;  %v4469_v31 = vsel %vm1120_vm7, %v1608_v20, %v3084_v26  ;;  %v4472_v2 = vsel %vm1120_vm7, %v1609_v51, %v3085_v60 }
 0x2a1   : > { %v1647_v48 = vpack.c.bf16 %v1639_v17, %v1638_v40 }
 0x2a3   : > { %1853 = vmatprep.mubr.bf16.mxu1 %v1647_v48  ;;  %v5141_v48 = vld [vmem:[#allocation45_spill] sm:$0xff] }
 0x2ac   : > { %v3088_v47 = vpop.permute.xlu0 %3087 }
 0x2ad   : > { %v3090_v51 = vunpack.i.h.bf16 %v3088_v47  ;;  %v3089_v61 = vunpack.i.l.bf16 %v3088_v47 }
 0x2b0   : > { %v3093_v39 = vpop.permute.xlu0 %3092 }
 0x2b1   : > { %v3095_v46 = vunpack.i.h.bf16 %v3093_v39  ;;  %v3094_v58 = vunpack.i.l.bf16 %v3093_v39  ;;  %v1326_v39 = vmul.f32 %v4413_v30, %v5141_v48 }
 0x2b3   : > { %v1625_v34 = vsel %vm1084_vm3, %v4169_v42, %v3095_v46  ;;  %v1624_v60 = vsel %vm1084_vm3, %v4155_v23, %v3094_v58 }
 0x2b4   : > { %v3098_v32 = vpop.permute.xlu0 %3097 }
 0x2b5   : > { %v3100_v16 = vunpack.i.h.bf16 %v3098_v32  ;;  %v3099_v49 = vunpack.i.l.bf16 %v3098_v32  ;;  %v5142_v32 = vld [vmem:[#allocation44_spill] sm:$0xff] }
 0x2b6   : > { %v1327_v42 = vmul.f32 %v4362_v62, %v5142_v32 }
 0x2b7   : > { %v1633_v18 = vsel %vm1102_vm5, %v1625_v34, %v3100_v16  ;;  %v1632_v26 = vsel %vm1102_vm5, %v1624_v60, %v3099_v49 }
 0x2b8   : > { %v1640_v23 = vsel %vm1120_vm7, %v1632_v26, %v3089_v61  ;;  %v1641_v58 = vsel %vm1120_vm7, %v1633_v18, %v3090_v51 }
 0x2bb   : > { %v3103_v7 = vpop.permute.xlu1 %3102 }
 0x2bc   : > { %v3108_v37 = vpop.permute.xlu0 %3107  ;;  %v3105_v63 = vunpack.i.h.bf16 %v3103_v7  ;;  %v3104_v25 = vunpack.i.l.bf16 %v3103_v7 }
 0x2bd   : > { %v3110_v60 = vunpack.i.h.bf16 %v3108_v37 }
 0x2be   : > { %v1599_v16 = vsel %vm1084_vm3, %v1327_v42, %v3105_v63  ;;  %v1598_v7 = vsel %vm1084_vm3, %v1326_v39, %v3104_v25  ;;  %v3322_v25 = vld [vmem:[%s4978_s4 + $0x88] sm:$0xff]  }
 0x2bf   : > { %v3113_v38 = vpop.permute.xlu1 %3112 }
 0x2c0   : > { %v3128_v20 = vpop.permute.xlu0 %3127  ;;  %v3115_v40 = vunpack.i.h.bf16 %v3113_v38  ;;  %v3114_v17 = vunpack.i.l.bf16 %v3113_v38  ;;  %v3109_v38 = vunpack.i.l.bf16 %v3108_v37  ;;  %v1650_v37 = vpack.c.bf16 %v1641_v58, %v1640_v23 }
 0x2c1   : > { %v3130_v48 = vunpack.i.h.bf16 %v3128_v20  ;;  %v3129_v62 = vunpack.i.l.bf16 %v3128_v20  ;;  %v1331_v58 = vmul.f32 %v4274_v12, %v4038_v14 }
 0x2c2   : > { %v1606_v36 = vsel %vm1102_vm5, %v1598_v7, %v3114_v17  ;;  %v1607_v30 = vsel %vm1102_vm5, %v1599_v16, %v3115_v40  ;;  %v1627_v17 = vsel %vm1084_vm3, %v4254_v6, %v3110_v60  ;;  %v1626_v20 = vsel %vm1084_vm3, %v4247_v21, %v3109_v38 }
 0x2c3   : > { %v3118_v46 = vpop.permute.xlu1 %3117  ;;  %v1635_v40 = vsel %vm1102_vm5, %v1627_v17, %v3130_v48  ;;  %v1330_v21 = vmul.f32 %v4203_v44, %v4040_v45 }
 0x2c4   : > { %v3120_v49 = vunpack.i.h.bf16 %v3118_v46  ;;  %v3119_v34 = vunpack.i.l.bf16 %v3118_v46  ;;  %v3138_v47 = vpop.permute.xlu0 %3137 }
 0x2c5   : > { %v3140_v18 = vunpack.i.h.bf16 %v3138_v47  ;;  %v3139_v51 = vunpack.i.l.bf16 %v3138_v47 }
 0x2c6   : > { %v1614_v32 = vsel %vm1120_vm7, %v1606_v36, %v3119_v34  ;;  %v1615_v26 = vsel %vm1120_vm7, %v1607_v30, %v3120_v49  ;;  %v1634_v36 = vsel %vm1102_vm5, %v1626_v20, %v3129_v62 }
 0x2c7   : > { %v3123_v63 = vpop.permute.xlu1 %3122  ;;  %v1646_v61 = vpack.c.bf16 %v1615_v26, %v1614_v32  ;;  %v1642_v16 = vsel %vm1120_vm7, %v1634_v36, %v3139_v51  ;;  %v1643_v23 = vsel %vm1120_vm7, %v1635_v40, %v3140_v18 }
 0x2c8   : > { %v3153_v39 = vpop.permute.xlu0 %3152  ;;  %v3125_v32 = vunpack.i.h.bf16 %v3123_v63  ;;  %v3124_v42 = vunpack.i.l.bf16 %v3123_v63  ;;  %v1653_v49 = vpack.c.bf16 %v1643_v23, %v1642_v16 }
 0x2c9   : > { %1854 = vmatmul.mubr.bf16.vlgmr.msra.gmra.mrb[0].mxu1 %v1646_v61  ;;  %v3155_v47 = vunpack.i.h.bf16 %v3153_v39  ;;  %v3154_v60 = vunpack.i.l.bf16 %v3153_v39 }
 0x2ca   : > { %2875 = vmatpush3.bf16.msra.mxu1 %v4371_v27  ;;  %1861 = vmatprep.mubr.bf16.mxu1 %v1650_v37  ;;  %v1603_v27 = vsel %vm1084_vm3, %v1331_v58, %v3125_v32  ;;  %v1602_v34 = vsel %vm1084_vm3, %v1330_v21, %v3124_v42 }
 0x2cb   : > { %v3133_v46 = vpop.permute.xlu1 %3132  ;;  %2876 = vmatprep.subr.bf16.mxu1 %v3322_v25  ;;  %v1629_v17 = vsel %vm1084_vm3, %v4316_v28, %v3155_v47  ;;  %v1628_v20 = vsel %vm1084_vm3, %v4306_v11, %v3154_v60  ;;  %v1332_v11 = vmul.f32 %v4350_v57, %v4082_v54  ;;  %v1333_v28 = vmul.f32 %v4340_v53, %v4093_v52 }
 0x2cc   : > { %v3158_v6 = vpop.permute.xlu0 %3157  ;;  %v3135_v7 = vunpack.i.h.bf16 %v3133_v46  ;;  %v3134_v48 = vunpack.i.l.bf16 %v3133_v46  ;;  %v5144_v53 = vpack.c.bf16 %v4225_v5, %v4222_v3  ;;  %v3323_v3 = vld [vmem:[%s4980_s6 + $0x80] sm:$0xff]   ;;  %v3324_v5 = vld [vmem:[%s4980_s6 + $0x88] sm:$0xff]  }
 0x2cd   : > { %v3160_v30 = vunpack.i.h.bf16 %v3158_v6  ;;  %v3159_v62 = vunpack.i.l.bf16 %v3158_v6 }
 0x2ce   : > { %2877 = vmatpush3.bf16.msra.mxu1 %v3322_v25  ;;  %v1610_v44 = vsel %vm1102_vm5, %v1602_v34, %v3134_v48  ;;  %v1611_v12 = vsel %vm1102_vm5, %v1603_v27, %v3135_v7  ;;  %v5143_v25 = vpack.c.bf16 %v4472_v2, %v4469_v31 }
 0x2cf   : > { %v3143_v38 = vpop.permute.xlu1 %3142  ;;  %v1636_v32 = vsel %vm1102_vm5, %v1628_v20, %v3159_v62  ;;  %v1637_v42 = vsel %vm1102_vm5, %v1629_v17, %v3160_v30  ;;  %v5145_v62 = vpack.c.bf16 %v4290_v13, %v4286_v8  ;;  %2886 = vmatprep.subr.bf16.mxu1 %v3323_v3  ;;  %v3326_v8 = vld [vmem:[%s4980_s6] sm:$0xff]   ;;  %v3327_v13 = vld [vmem:[%s4980_s6 + $0x48] sm:$0xff]  }
 0x2d0   : > { %v3145_v26 = vunpack.i.h.bf16 %v3143_v38  ;;  %v3144_v18 = vunpack.i.l.bf16 %v3143_v38  ;;  %v3163_v51 = vpop.permute.xlu0 %3162 }
 0x2d1   : > { %v3165_v63 = vunpack.i.h.bf16 %v3163_v51  ;;  %v3164_v61 = vunpack.i.l.bf16 %v3163_v51  ;;  %1862 = vmatmul.mubr.bf16.gmra.mrb[4].mxu1 %v5143_v25 }
 0x2d2   : > { %1869 = vmatprep.mubr.bf16.mxu1 %v1653_v49  ;;  %v1618_v37 = vsel %vm1120_vm7, %v1610_v44, %v3144_v18  ;;  %v1619_v39 = vsel %vm1120_vm7, %v1611_v12, %v3145_v26  ;;  %v5146_v26 = vpack.c.bf16 %v4391_v15, %v4388_v59  ;;  %v5147_v18 = vpack.c.bf16 %v4398_v56, %v4394_v55  ;;  %v3325_v59 = vld [vmem:[%s4980_s6 + $0x40] sm:$0xff]   ;;  %v3328_v15 = vld [vmem:[%s4980_s6 + $0x8] sm:$0xff]  }
 0x2d3   : > { %v3148_v36 = vpop.permute.xlu1 %3147  ;;  %v1652_v40 = vpack.c.bf16 %v1619_v39, %v1618_v37  ;;  %v1644_v31 = vsel %vm1120_vm7, %v1636_v32, %v3164_v61  ;;  %v1645_v2 = vsel %vm1120_vm7, %v1637_v42, %v3165_v63  ;;  %2828 = vmatprep.subr.bf16.mxu0 %v3325_v59 }
 0x2d4   : > { %v3150_v16 = vunpack.i.h.bf16 %v3148_v36  ;;  %v3149_v23 = vunpack.i.l.bf16 %v3148_v36  ;;  %v1656_v6 = vpack.c.bf16 %v1645_v2, %v1644_v31  ;;  %2829 = vmatpush3.bf16.msra.mxu0 %v3326_v8 }
 0x2d5   : > { %2830 = vmatprep.subr.bf16.mxu0 %v3327_v13 }
 0x2d6   : > { %v1605_v48 = vsel %vm1084_vm3, %v1333_v28, %v3150_v16  ;;  %v1604_v49 = vsel %vm1084_vm3, %v1332_v11, %v3149_v23  ;;  %v2733_v11 = vld [vmem:[%s4979_s5] ss:$0 sm:$0xff] }
 0x2d7   : > { %v3168_v46 = vpop.permute.xlu1 %3167 }
 0x2d8   : > { %v3170_v21 = vunpack.i.h.bf16 %v3168_v46  ;;  %v3169_v58 = vunpack.i.l.bf16 %v3168_v46  ;;  %2831 = vmatpush3.bf16.msra.mxu0 %v3328_v15 }
 0x2d9   : > { %1870 = vmatmul.mubr.bf16.gmra.mrb[8].mxu1 %v1652_v40 }
 0x2da   : > { %1877 = vmatprep.mubr.bf16.mxu1 %v1656_v6  ;;  %v1612_v47 = vsel %vm1102_vm5, %v1604_v49, %v3169_v58  ;;  %v1613_v60 = vsel %vm1102_vm5, %v1605_v48, %v3170_v21 }
 0x2db   : > { %v3173_v7 = vpop.permute.xlu1 %3172 }
 0x2dc   : > { %v3175_v27 = vunpack.i.h.bf16 %v3173_v7  ;;  %v3174_v34 = vunpack.i.l.bf16 %v3173_v7 }
 0x2de   : > { %v1620_v38 = vsel %vm1120_vm7, %v1612_v47, %v3174_v34  ;;  %v1621_v30 = vsel %vm1120_vm7, %v1613_v60, %v3175_v27  ;;  %v3329_v47 = vld [vmem:[%s4980_s6 + $0x50] sm:$0xff]  }
 0x2df   : > { %v1655_v57 = vpack.c.bf16 %v1621_v30, %v1620_v38  ;;  %v3330_v60 = vld [vmem:[%s4980_s6 + $0x10] sm:$0xff]   ;;  %2832 = vmatprep.subr.bf16.mxu0 %v3329_v47 }
 0x2e0   : > { %2833 = vmatpush3.bf16.msra.mxu0 %v3330_v60 }
 0x2e1   : > { %1878 = vmatmul.mubr.bf16.gmra.mrb[12].mxu1 %v1655_v57 }
 0x2e2   : > { %2878 = vmatprep.mubr.msk.bf16.mxu1 %vm1084_vm3, %v5144_v53 }
 0x2e9   : > { %2879 = vmatmul.mubr.msk.bf16.vlgmr.msra.gmra.mrb[16].mxu1 %vm1084_vm3, %v5145_v62 }
 0x2ea   : > { %2882 = vmatprep.mubr.msk.bf16.mxu1 %vm1084_vm3, %v5146_v26  ;;  %2887 = vmatpush3.bf16.msra.mxu1 %v3323_v3 }
 0x2eb   : > { %2888 = vmatprep.subr.bf16.mxu1 %v3324_v5 }
 0x2ee   : > { %2889 = vmatpush3.bf16.msra.mxu1 %v3324_v5 }
 0x2f1   : > { %2883 = vmatmul.mubr.msk.bf16.gmra.mrb[20].mxu1 %vm1084_vm3, %v5147_v18 }
 0x39c   : > { %v2798_v55 = vpop.f32.mrb[0].mxu1 }
 0x39d   : > { %v2799_v56 = vpop.f32.mrb[1].mxu1 }
 0x39e   : > { %v2800_v51 = vadd.f32 %v2799_v56, %v2798_v55  ;;  %v2801_v44 = vpop.f32.mrb[2].mxu1 }
 0x39f   : > { %v2802_v12 = vpop.f32.mrb[3].mxu1 }
 0x3a0   : > { %v2803_v63 = vadd.f32 %v2802_v12, %v2801_v44  ;;  %v1856_v48 = vadd.f32 %v2800_v51, %v2733_v11 }
 0x3a2   : > { %v1859_v57 = vadd.f32 %v2803_v63, %v2733_v11 }
 0x3a4   : > { %v2804_v61 = vpop.f32.mrb[4].mxu1 }
 0x3a5   : > { %v2805_v25 = vpop.f32.mrb[5].mxu1 }
 0x3a6   : > { %v2806_v37 = vadd.f32 %v2805_v25, %v2804_v61  ;;  %v2807_v39 = vpop.f32.mrb[6].mxu1 }
 0x3a7   : > { %v2808_v17 = vpop.f32.mrb[7].mxu1 }
 0x3a8   : > { %v2809_v20 = vadd.f32 %v2808_v17, %v2807_v39  ;;  %v1864_v28 = vadd.f32 %v2806_v37, %v2733_v11 }
 0x3aa   : > { %v1867_v34 = vadd.f32 %v2809_v20, %v2733_v11 }
 0x3ac   : > { %v2810_v36 = vpop.f32.mrb[8].mxu1 }
 0x3ad   : > { %v2811_v40 = vpop.f32.mrb[9].mxu1 }
 0x3ae   : > { %v2812_v32 = vadd.f32 %v2811_v40, %v2810_v36  ;;  %v2813_v42 = vpop.f32.mrb[10].mxu1 }
 0x3af   : > { %v2814_v31 = vpop.f32.mrb[11].mxu1 }
 0x3b0   : > { %v2815_v2 = vadd.f32 %v2814_v31, %v2813_v42  ;;  %v1872_v5 = vadd.f32 %v2812_v32, %v2733_v11 }
 0x3b2   : > { %v1875_v15 = vadd.f32 %v2815_v2, %v2733_v11 }
 0x3b4   : > { %v2816_v46 = vpop.f32.mrb[12].mxu1 }
 0x3b5   : > { %v2817_v16 = vpop.f32.mrb[13].mxu1 }
 0x3b6   : > { %v2818_v23 = vadd.f32 %v2817_v16, %v2816_v46  ;;  %v2819_v6 = vpop.f32.mrb[14].mxu1 }
 0x3b7   : > { %v2820_v21 = vpop.f32.mrb[15].mxu1 }
 0x3b8   : > { %v2821_v58 = vadd.f32 %v2820_v21, %v2819_v6  ;;  %v1880_v8 = vadd.f32 %v2818_v23, %v2733_v11 }
 0x3ba   : > { %v1883_v13 = vadd.f32 %v2821_v58, %v2733_v11 }
 0x3bc   : > { %v2880_v7 = vpop.f32.mrb[16].mxu1 }
 0x3bd   : > { %v1929_v49 = vadd.f32 %v2880_v7, %v1864_v28  ;;  %v1920_v27 = vpop.f32.mrb[17].mxu1 }
 0x3be   : > { %v1921_v38 = vadd.f32 %v1920_v27, %v1856_v48  ;;  %v2881_v30 = vpop.f32.mrb[18].mxu1  ;;  %v3334_v27 = vld [vmem:[%s4980_s6 + $0x20] sm:$0xff]  }
 0x3bf   : > { %v4580_v53 = vmax.f32 %v1929_v49, 0.0  ;;  %v1932_v62 = vadd.f32 %v2881_v30, %v1867_v34  ;;  %v1923_v26 = vpop.f32.mrb[19].mxu1  ;;  %v3333_v49 = vld [vmem:[%s4980_s6 + $0x60] sm:$0xff]  }
 0x3c0   : > { %v1924_v18 = vadd.f32 %v1923_v26, %v1859_v57  ;;  %v4587_v56 = vmax.f32 %v1921_v38, 0.0  ;;  %v3335_v57 = vld [vmem:[%s4980_s6 + $0x68] sm:$0xff]  }
 0x3c1   : > { %v4582_v3 = vmax.f32 %v1932_v62, 0.0  ;;  %v1993_v55 = vrot.slane %v4580_v53, 1  ;;  %v2040_v44 = vmul.f32 %v4580_v53, %v3770_v0  ;;  %v1986_v37 = vmul.f32 %v4580_v53, %v3780_v9 }
 0x3c2   : > { %v4584_v59 = vmax.f32 %v1924_v18, 0.0  ;;  %v1961_v39 = vrot.slane %v4580_v53, 7  ;;  %v1991_v2 = vrot.slane %v4587_v56, 1  ;;  %v1959_v60 = vrot.slane %v4587_v56, 7 }
 0x3c3   : > { %v1994_v51 = vrot.slane %v4582_v3, 1  ;;  %v1962_v17 = vrot.slane %v4582_v3, 7 }
 0x3c4   : > { %v1992_v12 = vrot.slane %v4584_v59, 1  ;;  %v2884_v63 = vpop.f32.mrb[20].mxu1  ;;  %v2039_v61 = vmul.f32 %v4584_v59, %v3772_v1  ;;  %v1985_v25 = vmul.f32 %v4584_v59, %v3782_v10  ;;  %v3331_v1 = vld [vmem:[%s4980_s6 + $0x58] sm:$0xff]   ;;  %v1960_v7 = vrot.slane %v4584_v59, 7 }
 0x3c5   : > { %v1945_v20 = vadd.f32 %v2884_v63, %v1880_v8  ;;  %v1936_v36 = vpop.f32.mrb[21].mxu1  ;;  %v4603_v0 = vsel %vm554_vm0, %v1993_v55, %v1994_v51  ;;  %v3332_v10 = vld [vmem:[%s4980_s6 + $0x18] sm:$0xff]   ;;  %2834 = vmatprep.subr.bf16.mxu0 %v3331_v1  ;;  %v4642_v47 = vsel %vm441_vm1, %v1961_v39, %v1962_v17  ;;  %v5153_v1 = vld [vmem:[#allocation48_spill] sm:$0xff] }
 0x3c6   : > { %v1937_v40 = vadd.f32 %v1936_v36, %v1872_v5  ;;  %v2885_v9 = vpop.f32.mrb[22].mxu1  ;;  %v3176_v32 = vpack.i.bf16 %v2040_v44, %v2039_v61  ;;  %v3181_v42 = vpack.i.bf16 %v1986_v37, %v1985_v25  ;;  %v2004_v31 = vsel %vm554_vm0, %v1992_v12, %v1993_v55  ;;  %2835 = vmatpush3.bf16.msra.mxu0 %v3332_v10  ;;  %v5148_v5 = vld [vmem:[#allocation9_spill] sm:$0xff]  ;;  %v3336_v44 = vld [vmem:[%s4980_s6 + $0x28] sm:$0xff]  }
 0x3c7   : > { %v1948_v46 = vadd.f32 %v2885_v9, %v1883_v13  ;;  %v1939_v16 = vpop.f32.mrb[23].mxu1  ;;  %v2047_v23 = vmul.f32 %v2004_v31, %v4023_v43  ;;  %v2048_v6 = vmul.f32 %v4603_v0, %v4021_v4  ;;  %v2009_v11 = vmul.f32 %v2004_v31, %v3799_v22  ;;  %2836 = vmatprep.subr.bf16.mxu0 %v3333_v49  ;;  %v5150_v61 = vld [vmem:[#allocation13_spill] sm:$0xff]  ;;  %v5151_v37 = vld [vmem:[#allocation11_spill] sm:$0xff]  ;;  %v5157_v49 = vld [vmem:[#allocation18_spill] sm:$0xff] }
 0x3c8   : > { %v4617_v21 = vmax.f32 %v1937_v40, 0.0  ;;  %v1940_v58 = vadd.f32 %v1939_v16, %v1875_v15  ;;  %3177 = vrot.lane.b32.xlu0 %v3176_v32, %s3355_s30  ;;  %3182 = vrot.lane.b32.xlu1 %v3181_v42, %s3351_s24  ;;  %v2010_v28 = vmul.f32 %v4603_v0, %v3797_v19  ;;  %v4625_v48 = vmax.f32 %v1945_v20, 0.0  ;;  %v5149_v15 = vld [vmem:[#allocation12_spill] sm:$0xff]  ;;  %v5152_v20 = vld [vmem:[#allocation10_spill] sm:$0xff]  ;;  %v5154_v40 = vld [vmem:[#allocation47_spill] sm:$0xff] }
 0x3c9   : > { %v4627_v43 = vmax.f32 %v1948_v46, 0.0  ;;  %v2297_v4 = vpack.c.bf16 %v2048_v6, %v2047_v23  ;;  %v2005_v38 = vsel %vm554_vm0, %v1991_v2, %v1992_v12  ;;  %v2024_v30 = vmul.f32 %v2004_v31, %v3742_v50  ;;  %v5155_v42 = vld [vmem:[#allocation4_spill] sm:$0xff] }
 0x3ca   : > { %v1995_v22 = vrot.slane %v4617_v21, 1  ;;  %v4636_v34 = vmax.f32 %v1940_v58, 0.0  ;;  %v3196_v19 = vpack.i.bf16 %v2010_v28, %v2009_v11  ;;  %v2023_v8 = vmul.f32 %v2005_v38, %v5148_v5  ;;  %2837 = vmatpush3.bf16.msra.mxu0 %v3334_v27  ;;  %v5156_v58 = vld [vmem:[#allocation6_spill] sm:$0xff]  ;;  %v5160_v5 = vld [vmem:[#allocation19_spill] sm:$0xff] }
 0x3cb   : > { %2890 = vmatprep.mubr.msk.bf16.mxu1 %vm1084_vm3, %v2297_v4  ;;  %v1998_v26 = vrot.slane %v4627_v43, 1  ;;  %v1997_v13 = vrot.slane %v4625_v48, 1  ;;  %v4663_v50 = vsel %vm441_vm1, %v1960_v7, %v1961_v39  ;;  %v2018_v55 = vmul.f32 %v4642_v47, %v5149_v15  ;;  %2838 = vmatprep.subr.bf16.mxu0 %v3335_v57  ;;  %v5161_v15 = vld [vmem:[#allocation3_spill] sm:$0xff] }
 0x3cc   : > { %v4654_v62 = vsel %vm554_vm0, %v1994_v51, %v1995_v22  ;;  %v1996_v18 = vrot.slane %v4636_v34, 1  ;;  %3197 = vrot.lane.b32.xlu1 %v3196_v19, %s3350_s20  ;;  %v4669_v51 = vsel %vm441_vm1, %v1959_v60, %v1960_v7  ;;  %v3186_v63 = vpack.i.bf16 %v2024_v30, %v2023_v8  ;;  %v3337_v7 = vld [vmem:[%s4980_s6 + $0x70] sm:$0xff]   ;;  %v5159_v30 = vld [vmem:[#allocation50_spill] sm:$0xff] }
 0x3cd   : > { %v2017_v25 = vmul.f32 %v4663_v50, %v5150_v61  ;;  %v2031_v39 = vmul.f32 %v4669_v51, %v5151_v37  ;;  %v2032_v36 = vmul.f32 %v4663_v50, %v5152_v20  ;;  %v2049_v10 = vmul.f32 %v4654_v62, %v5153_v1 }
 0x3ce   : > { %v4676_v12 = vsel %vm554_vm0, %v1995_v22, %v1996_v18  ;;  %3187 = vrot.lane.b32.xlu0 %v3186_v63, %s3351_s24  ;;  %v1983_v31 = vmul.f32 %v4627_v43, %v5155_v42  ;;  %v4693_v46 = vsel %vm554_vm0, %v1997_v13, %v1998_v26  ;;  %v4697_v16 = vsel %vm554_vm0, %v1996_v18, %v1997_v13  ;;  %v5158_v22 = vld [vmem:[#allocation49_spill] sm:$0xff]  ;;  %v5166_v42 = vld [vmem:[#allocation8_spill] sm:$0xff] }
 0x3cf   : > { %v2050_v9 = vmul.f32 %v4676_v12, %v5154_v40  ;;  %v3201_v32 = vpack.i.bf16 %v2018_v55, %v2017_v25  ;;  %v1966_v23 = vrot.slane %v4627_v43, 7  ;;  %v1984_v11 = vmul.f32 %v4587_v56, %v5156_v58  ;;  %2839 = vmatpush3.bf16.msra.mxu0 %v3336_v44  ;;  %v5162_v44 = vld [vmem:[#allocation51_spill] sm:$0xff]  ;;  %v3339_v25 = vld [vmem:[%s4980_s6 + $0x78] sm:$0xff]  }
 0x3d0   : > { %v4704_v28 = vsel %vm554_vm0, %v1998_v26, %v1991_v2  ;;  %v3191_v4 = vpack.i.bf16 %v2032_v36, %v2031_v39  ;;  %v2042_v27 = vmul.f32 %v4617_v21, %v5157_v49  ;;  %v2051_v19 = vmul.f32 %v4697_v16, %v5158_v22  ;;  %v3338_v26 = vld [vmem:[%s4980_s6 + $0x30] sm:$0xff]   ;;  %2840 = vmatprep.subr.bf16.mxu0 %v3337_v7  ;;  %v5164_v36 = vld [vmem:[#allocation14_spill] sm:$0xff] }
 0x3d1   : > { %v2300_v6 = vpack.c.bf16 %v2050_v9, %v2049_v10  ;;  %3202 = vrot.lane.b32.xlu1 %v3201_v32, %s3355_s30  ;;  %v2052_v57 = vmul.f32 %v4693_v46, %v5159_v30  ;;  %v1963_v2 = vrot.slane %v4617_v21, 7  ;;  %v3211_v18 = vpack.i.bf16 %v1984_v11, %v1983_v31  ;;  %v5163_v39 = vld [vmem:[#allocation5_spill] sm:$0xff]  ;;  %v5165_v9 = vld [vmem:[#allocation15_spill] sm:$0xff]  ;;  %v5168_v11 = vld [vmem:[#allocation16_spill] sm:$0xff] }
 0x3d2   : > { %3192 = vrot.lane.b32.xlu0 %v3191_v4, %s3350_s20  ;;  %v2041_v8 = vmul.f32 %v4582_v3, %v5160_v5  ;;  %v2007_v55 = vmul.f32 %v4704_v28, %v5161_v15  ;;  %v2053_v63 = vmul.f32 %v4704_v28, %v5162_v44  ;;  %v4732_v61 = vsel %vm441_vm1, %v1966_v23, %v1959_v60  ;;  %v5169_v4 = vld [vmem:[#allocation17_spill] sm:$0xff]  ;;  %v5173_v44 = vld [vmem:[#allocation32_spill] sm:$0xff] }
 0x3d3   : > { %2891 = vmatmul.mubr.msk.bf16.vlgmr.msra.gmra.mrb[24].mxu1 %vm1084_vm3, %v2300_v6  ;;  %v2303_v13 = vpack.c.bf16 %v2052_v57, %v2051_v19  ;;  %v2008_v20 = vmul.f32 %v2005_v38, %v5163_v39  ;;  %v2026_v1 = vmul.f32 %v4654_v62, %v5164_v36  ;;  %v2054_v10 = vmul.f32 %v2005_v38, %v4107_v24  ;;  %v3340_v24 = vld [vmem:[%s4980_s6 + $0x38] sm:$0xff]   ;;  %v5167_v38 = vld [vmem:[#allocation7_spill] sm:$0xff] }
 0x3d4   : > { %v3206_v37 = vpack.i.bf16 %v2042_v27, %v2041_v8  ;;  %v4747_v60 = vsel %vm441_vm1, %v1962_v17, %v1963_v2  ;;  %2841 = vmatpush3.bf16.msra.mxu0 %v3338_v26  ;;  %v2025_v32 = vmul.f32 %v4603_v0, %v5165_v9  ;;  %v2015_v31 = vmul.f32 %v4732_v61, %v5166_v42  ;;  %v5170_v19 = vld [vmem:[#allocation21_spill] sm:$0xff]  ;;  %v5171_v57 = vld [vmem:[#allocation31_spill] sm:$0xff]  ;;  %v5172_v8 = vld [vmem:[#allocation30_spill] sm:$0xff] }
 0x3d5   : > { %3212 = vrot.lane.b32.xlu1 %v3211_v18, %s3351_s24  ;;  %2894 = vmatprep.mubr.msk.bf16.mxu1 %vm1084_vm3, %v2303_v13  ;;  %v3226_v40 = vpack.i.bf16 %v2008_v20, %v2007_v55  ;;  %v2306_v6 = vpack.c.bf16 %v2054_v10, %v2053_v63  ;;  %v2016_v58 = vmul.f32 %v4669_v51, %v5167_v38  ;;  %v1964_v18 = vrot.slane %v4636_v34, 7  ;;  %v5175_v39 = vld [vmem:[#allocation26_spill] sm:$0xff]  ;;  %v5180_v38 = vld [vmem:[#allocation24_spill] sm:$0xff] }
 0x3d6   : > { %3207 = vrot.lane.b32.xlu0 %v3206_v37, %s3355_s30  ;;  %2842 = vmatprep.subr.bf16.mxu0 %v3339_v25  ;;  %v3216_v17 = vpack.i.bf16 %v2026_v1, %v2025_v32  ;;  %v2034_v7 = vmul.f32 %v4747_v60, %v5168_v11  ;;  %v2033_v49 = vmul.f32 %v4642_v47, %v5169_v4  ;;  %v1965_v15 = vrot.slane %v4625_v48, 7  ;;  %v5174_v25 = vld [vmem:[#allocation27_spill] sm:$0xff]  ;;  %v5176_v10 = vld [vmem:[#allocation22_spill] sm:$0xff]  ;;  %v5183_v4 = vld [vmem:[#allocation25_spill] sm:$0xff] }
 0x3d7   : > { %v3231_v0 = vpack.i.bf16 %v2016_v58, %v2015_v31  ;;  %v1988_v27 = vmul.f32 %v4617_v21, %v5123_v33  ;;  %v1987_v30 = vmul.f32 %v4582_v3, %v5170_v19  ;;  %v2043_v26 = vmul.f32 %v4636_v34, %v5171_v57  ;;  %v5177_v32 = vld [vmem:[#allocation23_spill] sm:$0xff]  ;;  %v5178_v31 = vld [vmem:[#allocation29_spill] sm:$0xff]  ;;  %v5185_v57 = vld [vmem:[#allocation34_spill] sm:$0xff] }
 0x3d8   : > { %2843 = vmatpush3.bf16.msra.mxu0 %v3340_v24  ;;  %v3221_v22 = vpack.i.bf16 %v2034_v7, %v2033_v49  ;;  %v2044_v13 = vmul.f32 %v4625_v48, %v5172_v8  ;;  %v1989_v33 = vmul.f32 %v4636_v34, %v5136_v35  ;;  %v1990_v63 = vmul.f32 %v4625_v48, %v5173_v44  ;;  %v5179_v24 = vld [vmem:[#allocation28_spill] sm:$0xff]  ;;  %v5181_v11 = vld [vmem:[#allocation39_spill] sm:$0xff] }
 0x3d9   : > { %3227 = vrot.lane.b32.xlu1 %v3226_v40, %s3350_s20  ;;  %v3236_v5 = vpack.i.bf16 %v1988_v27, %v1987_v30  ;;  %v2027_v37 = vmul.f32 %v4676_v12, %v5174_v25  ;;  %v2028_v20 = vmul.f32 %v4697_v16, %v5175_v39  ;;  %v4789_v36 = vsel %vm441_vm1, %v1964_v18, %v1965_v15  ;;  %v5184_v19 = vld [vmem:[#allocation35_spill] sm:$0xff]  ;;  %v5187_v8 = vld [vmem:[#allocation40_spill] sm:$0xff] }
 0x3da   : > { %3217 = vrot.lane.b32.xlu0 %v3216_v17, %s3351_s24  ;;  %v3241_v55 = vpack.i.bf16 %v2044_v13, %v2043_v26  ;;  %v4793_v35 = vsel %vm441_vm1, %v1963_v2, %v1964_v18  ;;  %v3261_v1 = vpack.i.bf16 %v1990_v63, %v1989_v33  ;;  %v2012_v40 = vmul.f32 %v4676_v12, %v5176_v10  ;;  %v5188_v13 = vld [vmem:[#allocation37_spill] sm:$0xff]  ;;  %v5191_v63 = vld [vmem:[#allocation42_spill] sm:$0xff] }
 0x3db   : > { %2895 = vmatmul.mubr.msk.bf16.gmra.mrb[28].mxu1 %vm1084_vm3, %v2306_v6  ;;  %v3246_v9 = vpack.i.bf16 %v2028_v20, %v2027_v37  ;;  %v2011_v42 = vmul.f32 %v4654_v62, %v5177_v32  ;;  %v2035_v6 = vmul.f32 %v4793_v35, %v5178_v31  ;;  %v2036_v17 = vmul.f32 %v4789_v36, %v5179_v24  ;;  %v5192_v24 = vld [vmem:[#allocation46_spill] sm:$0xff] }
 0x3dc   : > { %v2020_v58 = vmul.f32 %v4793_v35, %v5180_v38  ;;  %v2029_v7 = vmul.f32 %v4693_v46, %v5181_v11  ;;  %v2019_v49 = vmul.f32 %v4747_v60, %v5183_v4  ;;  %v4819_v27 = vsel %vm441_vm1, %v1965_v15, %v1966_v23  ;;  %v5189_v15 = vld [vmem:[#allocation36_spill] sm:$0xff] }
 0x3dd   : > { %3232 = vrot.lane.b32.xlu1 %v3231_v0, %s3355_s30  ;;  %v3276_v2 = vpack.i.bf16 %v2012_v40, %v2011_v42  ;;  %v3251_v12 = vpack.i.bf16 %v2036_v17, %v2035_v6  ;;  %v5182_v0 = vld [vmem:[#allocation38_spill] sm:$0xff]  ;;  %v2013_v30 = vmul.f32 %v4697_v16, %v5184_v19  ;;  %v2014_v26 = vmul.f32 %v4693_v46, %v5185_v57  ;;  %v5190_v46 = vld [vmem:[#allocation43_spill] sm:$0xff] }
 0x3de   : > { %3222 = vrot.lane.b32.xlu0 %v3221_v22, %s3350_s20  ;;  %v2030_v62 = vmul.f32 %v4704_v28, %v5182_v0  ;;  %v3281_v22 = vpack.i.bf16 %v2020_v58, %v2019_v49  ;;  %v5186_v28 = vld [vmem:[#allocation41_spill] sm:$0xff]  ;;  %v2038_v41 = vmul.f32 %v4732_v61, %v5187_v8  ;;  %v2021_v33 = vmul.f32 %v4789_v36, %v5188_v13 }
 0x3df   : > { %v3286_v23 = vpack.i.bf16 %v2014_v26, %v2013_v30  ;;  %v2022_v16 = vmul.f32 %v4819_v27, %v5189_v15  ;;  %v2045_v44 = vmul.f32 %v4627_v43, %v5190_v46  ;;  %v2046_v25 = vmul.f32 %v4587_v56, %v5191_v63 }
 0x3e0   : > { %v3256_v18 = vpack.i.bf16 %v2030_v62, %v2029_v7  ;;  %v1977_v6 = vmul.f32 %v4669_v51, %v4032_v29  ;;  %v1978_v17 = vmul.f32 %v4663_v50, %v5192_v24 }
 0x3e1   : > { %3237 = vrot.lane.b32.xlu1 %v3236_v5, %s3351_s24  ;;  %v2037_v5 = vmul.f32 %v4819_v27, %v5186_v28  ;;  %v3291_v37 = vpack.i.bf16 %v2022_v16, %v2021_v33  ;;  %v3271_v39 = vpack.i.bf16 %v2046_v25, %v2045_v44  ;;  %v5194_v25 = vld [vmem:[#allocation44_spill] sm:$0xff] }
 0x3e2   : > { %3242 = vrot.lane.b32.xlu0 %v3241_v55, %s3355_s30 }
 0x3e3   : > { %v3266_v55 = vpack.i.bf16 %v2038_v41, %v2037_v5 }
 0x3e5   : > { %3262 = vrot.lane.b32.xlu1 %v3261_v1, %s3351_s24 }
 0x3e6   : > { %3247 = vrot.lane.b32.xlu0 %v3246_v9, %s3351_s24 }
 0x3e9   : > { %3277 = vrot.lane.b32.xlu1 %v3276_v2, %s3350_s20 }
 0x3ea   : > { %3252 = vrot.lane.b32.xlu0 %v3251_v12, %s3350_s20 }
 0x3ed   : > { %3282 = vrot.lane.b32.xlu1 %v3281_v22, %s3355_s30 }
 0x3ee   : > { %3257 = vrot.lane.b32.xlu0 %v3256_v18, %s3351_s24  ;;  %s357_s24 = scalar_lea.vmem %s4984_s10, %s5196_s16 }
 0x3f1   : > { %3287 = vrot.lane.b32.xlu1 %v3286_v23, %s3350_s20 }
 0x3f2   : > { %3267 = vrot.lane.b32.xlu0 %v3266_v55, %s3350_s20 }
 0x3f5   : > { %3292 = vrot.lane.b32.xlu1 %v3291_v37, %s3355_s30  ;;  %v1976_v37 = vmul.f32 %v4732_v61, %v5194_v25 }
 0x3f6   : > { %3272 = vrot.lane.b32.xlu0 %v3271_v39, %s3355_s30 }
 0x43a   : > { %v3183_v20 = vpop.permute.xlu1 %3182  ;;  %v3178_v1 = vpop.permute.xlu0 %3177 }
 0x43b   : > { %v3185_v40 = vunpack.i.h.bf16 %v3183_v20  ;;  %v3184_v9 = vunpack.i.l.bf16 %v3183_v20  ;;  %v3180_v62 = vunpack.i.h.bf16 %v3178_v1  ;;  %v3179_v30 = vunpack.i.l.bf16 %v3178_v1 }
 0x43d   : > { %v2249_v12 = vsel %vm1084_vm3, %v1977_v6, %v3184_v9  ;;  %v2250_v11 = vsel %vm1084_vm3, %v1978_v17, %v3185_v40 }
 0x43e   : > { %v3198_v10 = vpop.permute.xlu1 %3197 }
 0x43f   : > { %v3200_v32 = vunpack.i.h.bf16 %v3198_v10  ;;  %v3199_v42 = vunpack.i.l.bf16 %v3198_v10 }
 0x440   : > { %v3188_v31 = vpop.permute.xlu0 %3187 }
 0x441   : > { %v3190_v2 = vunpack.i.h.bf16 %v3188_v31  ;;  %v3189_v38 = vunpack.i.l.bf16 %v3188_v31  ;;  %v2257_v4 = vsel %vm1102_vm5, %v2249_v12, %v3199_v42  ;;  %v2258_v49 = vsel %vm1102_vm5, %v2250_v11, %v3200_v32 }
 0x443   : > { %v3203_v58 = vpop.permute.xlu1 %3202  ;;  %v2272_v57 = vsel %vm1084_vm3, %v4584_v59, %v3190_v2  ;;  %v2271_v26 = vsel %vm1084_vm3, %v4587_v56, %v3189_v38  ;;  %v5193_v56 = vld [vmem:[#allocation45_spill] sm:$0xff] }
 0x444   : > { %v3205_v7 = vunpack.i.h.bf16 %v3203_v58  ;;  %v3204_v0 = vunpack.i.l.bf16 %v3203_v58  ;;  %v3193_v22 = vpop.permute.xlu0 %3192  ;;  %v1975_v63 = vmul.f32 %v4819_v27, %v5193_v56 }
 0x445   : > { %v3195_v19 = vunpack.i.h.bf16 %v3193_v22  ;;  %v3194_v29 = vunpack.i.l.bf16 %v3193_v22 }
 0x446   : > { %v2265_v51 = vsel %vm1120_vm7, %v2257_v4, %v3204_v0  ;;  %v2266_v50 = vsel %vm1120_vm7, %v2258_v49, %v3205_v7 }
 0x447   : > { %v3213_v18 = vpop.permute.xlu1 %3212  ;;  %v2298_v28 = vpack.c.bf16 %v2266_v50, %v2265_v51  ;;  %v2280_v5 = vsel %vm1102_vm5, %v2272_v57, %v3195_v19  ;;  %v2279_v8 = vsel %vm1102_vm5, %v2271_v26, %v3194_v29  ;;  %v1979_v57 = vmul.f32 %v4642_v47, %v4040_v45 }
 0x448   : > { %v3208_v41 = vpop.permute.xlu0 %3207  ;;  %v2287_v23 = vsel %vm1120_vm7, %v2279_v8, %v3179_v30  ;;  %v2288_v13 = vsel %vm1120_vm7, %v2280_v5, %v3180_v62  ;;  %v3215_v16 = vunpack.i.h.bf16 %v3213_v18  ;;  %v3214_v55 = vunpack.i.l.bf16 %v3213_v18 }
 0x449   : > { %v2296_v33 = vpack.c.bf16 %v2288_v13, %v2287_v23  ;;  %v3210_v42 = vunpack.i.h.bf16 %v3208_v41  ;;  %v3209_v38 = vunpack.i.l.bf16 %v3208_v41  ;;  %v1980_v18 = vmul.f32 %v4747_v60, %v4038_v14 }
 0x44a   : > { %v2247_v10 = vsel %vm1084_vm3, %v1975_v63, %v3214_v55  ;;  %v2248_v40 = vsel %vm1084_vm3, %v1976_v37, %v3215_v16 }
 0x44b   : > { %v3228_v15 = vpop.permute.xlu1 %3227  ;;  %2502 = vmatprep.mubr.bf16.mxu0 %v2296_v33 }
 0x44c   : > { %v3230_v59 = vunpack.i.h.bf16 %v3228_v15  ;;  %v3229_v46 = vunpack.i.l.bf16 %v3228_v15  ;;  %v3218_v44 = vpop.permute.xlu0 %3217 }
 0x44d   : > { %v3220_v39 = vunpack.i.h.bf16 %v3218_v44  ;;  %v3219_v20 = vunpack.i.l.bf16 %v3218_v44 }
 0x44e   : > { %v2255_v31 = vsel %vm1102_vm5, %v2247_v10, %v3229_v46  ;;  %v2256_v6 = vsel %vm1102_vm5, %v2248_v40, %v3230_v59 }
 0x44f   : > { %v3233_v1 = vpop.permute.xlu1 %3232  ;;  %v2274_v58 = vsel %vm1084_vm3, %v4582_v3, %v3220_v39  ;;  %v2273_v12 = vsel %vm1084_vm3, %v4580_v53, %v3219_v20 }
 0x450   : > { %v3235_v9 = vunpack.i.h.bf16 %v3233_v1  ;;  %v3234_v32 = vunpack.i.l.bf16 %v3233_v1  ;;  %v3223_v24 = vpop.permute.xlu0 %3222 }
 0x451   : > { %v3225_v61 = vunpack.i.h.bf16 %v3223_v24  ;;  %v3224_v2 = vunpack.i.l.bf16 %v3223_v24  ;;  %v1982_v24 = vmul.f32 %v4789_v36, %v4093_v52 }
 0x452   : > { %v2263_v27 = vsel %vm1120_vm7, %v2255_v31, %v3234_v32  ;;  %v2264_v17 = vsel %vm1120_vm7, %v2256_v6, %v3235_v9 }
 0x453   : > { %v2295_v11 = vpack.c.bf16 %v2264_v17, %v2263_v27  ;;  %v3238_v7 = vpop.permute.xlu1 %3237  ;;  %v2282_v0 = vsel %vm1102_vm5, %v2274_v58, %v3225_v61  ;;  %v2281_v62 = vsel %vm1102_vm5, %v2273_v12, %v3224_v2  ;;  %v1981_v27 = vmul.f32 %v4793_v35, %v4082_v54 }
 0x454   : > { %v3243_v4 = vpop.permute.xlu0 %3242  ;;  %v2289_v49 = vsel %vm1120_vm7, %v2281_v62, %v3209_v38  ;;  %v2290_v22 = vsel %vm1120_vm7, %v2282_v0, %v3210_v42  ;;  %v3239_v3 = vunpack.i.l.bf16 %v3238_v7  ;;  %v3240_v26 = vunpack.i.h.bf16 %v3238_v7 }
 0x455   : > { %2503 = vmatmul.mubr.bf16.vlgmr.msra.gmra.mrb[16].mxu0 %v2295_v11  ;;  %v2299_v19 = vpack.c.bf16 %v2290_v22, %v2289_v49  ;;  %v3245_v15 = vunpack.i.h.bf16 %v3243_v4  ;;  %v3244_v16 = vunpack.i.l.bf16 %v3243_v4 }
 0x456   : > { %v2251_v41 = vsel %vm1084_vm3, %v1979_v57, %v3239_v3  ;;  %v2252_v46 = vsel %vm1084_vm3, %v1980_v18, %v3240_v26 }
 0x457   : > { %v3263_v29 = vpop.permute.xlu1 %3262  ;;  %2510 = vmatprep.mubr.bf16.mxu0 %v2299_v19 }
 0x458   : > { %v3248_v51 = vpop.permute.xlu0 %3247  ;;  %v3265_v1 = vunpack.i.h.bf16 %v3263_v29  ;;  %v3264_v10 = vunpack.i.l.bf16 %v3263_v29 }
 0x459   : > { %v3250_v50 = vunpack.i.h.bf16 %v3248_v51  ;;  %v3249_v30 = vunpack.i.l.bf16 %v3248_v51 }
 0x45a   : > { %v2254_v38 = vsel %vm1084_vm3, %v1982_v24, %v3265_v1  ;;  %v2253_v58 = vsel %vm1084_vm3, %v1981_v27, %v3264_v10 }
 0x45b   : > { %v3278_v53 = vpop.permute.xlu1 %3277  ;;  %v2276_v55 = vsel %vm1084_vm3, %v4636_v34, %v3250_v50  ;;  %v2275_v45 = vsel %vm1084_vm3, %v4617_v21, %v3249_v30 }
 0x45c   : > { %v3279_v5 = vunpack.i.l.bf16 %v3278_v53  ;;  %v3253_v8 = vpop.permute.xlu0 %3252  ;;  %v3280_v23 = vunpack.i.h.bf16 %v3278_v53 }
 0x45d   : > { %2511 = vmatmul.mubr.bf16.gmra.mrb[20].mxu0 %v2298_v28  ;;  %v3255_v13 = vunpack.i.h.bf16 %v3253_v8  ;;  %v3254_v33 = vunpack.i.l.bf16 %v3253_v8 }
 0x45e   : > { %v2259_v44 = vsel %vm1102_vm5, %v2251_v41, %v3279_v5  ;;  %v2260_v34 = vsel %vm1102_vm5, %v2252_v46, %v3280_v23  ;;  %v4923_v41 = vld [vmem:[%s4981_s7] ss:$0 sm:$0xff] }
 0x45f   : > { %v3283_v47 = vpop.permute.xlu1 %3282  ;;  %v2284_v59 = vsel %vm1102_vm5, %v2276_v55, %v3255_v13  ;;  %v2283_v14 = vsel %vm1102_vm5, %v2275_v45, %v3254_v33 }
 0x460   : > { %v3285_v60 = vunpack.i.h.bf16 %v3283_v47  ;;  %v3284_v28 = vunpack.i.l.bf16 %v3283_v47  ;;  %v3258_v56 = vpop.permute.xlu0 %3257  ;;  %v2291_v63 = vsel %vm1120_vm7, %v2283_v14, %v3244_v16  ;;  %v2292_v25 = vsel %vm1120_vm7, %v2284_v59, %v3245_v15  ;;  %v2608_v59 = vld [vmem:[%s4982_s8] sm:$0xff] }
 0x461   : > { %v2302_v37 = vpack.c.bf16 %v2292_v25, %v2291_v63  ;;  %v3260_v40 = vunpack.i.h.bf16 %v3258_v56  ;;  %v3259_v9 = vunpack.i.l.bf16 %v3258_v56 }
 0x462   : > { %v2267_v21 = vsel %vm1120_vm7, %v2259_v44, %v3284_v28  ;;  %v2268_v20 = vsel %vm1120_vm7, %v2260_v34, %v3285_v60  ;;  %v2609_v44 = vld [vmem:[%s4982_s8 + $0x8] sm:$0xff] }
 0x463   : > { %v3288_v39 = vpop.permute.xlu1 %3287  ;;  %2518 = vmatprep.mubr.bf16.mxu0 %v2302_v37  ;;  %v2301_v6 = vpack.c.bf16 %v2268_v20, %v2267_v21  ;;  %v2278_v7 = vsel %vm1084_vm3, %v4627_v43, %v3260_v40  ;;  %v2277_v0 = vsel %vm1084_vm3, %v4625_v48, %v3259_v9 }
 0x464   : > { %v3268_v32 = vpop.permute.xlu0 %3267  ;;  %v3290_v42 = vunpack.i.h.bf16 %v3288_v39  ;;  %v3289_v31 = vunpack.i.l.bf16 %v3288_v39 }
 0x465   : > { %v3270_v17 = vunpack.i.h.bf16 %v3268_v32  ;;  %v3269_v61 = vunpack.i.l.bf16 %v3268_v32  ;;  %2519 = vmatmul.mubr.bf16.gmra.mrb[24].mxu0 %v2301_v6  ;;  %v2610_v32 = vld [vmem:[%s4982_s8 + $0x10] sm:$0xff]  ;;  %v2611_v6 = vld [vmem:[%s4982_s8 + $0x18] sm:$0xff] }
 0x466   : > { %v2262_v52 = vsel %vm1102_vm5, %v2254_v38, %v3290_v42  ;;  %v2261_v54 = vsel %vm1102_vm5, %v2253_v58, %v3289_v31 }
 0x467   : > { %v3293_v2 = vpop.permute.xlu1 %3292  ;;  %v2285_v22 = vsel %vm1102_vm5, %v2277_v0, %v3269_v61  ;;  %v2286_v19 = vsel %vm1102_vm5, %v2278_v7, %v3270_v17 }
 0x468   : > { %v3295_v12 = vunpack.i.h.bf16 %v3293_v2  ;;  %v3294_v11 = vunpack.i.l.bf16 %v3293_v2  ;;  %v3273_v36 = vpop.permute.xlu0 %3272 }
 0x469   : > { %v3275_v35 = vunpack.i.h.bf16 %v3273_v36  ;;  %v3274_v62 = vunpack.i.l.bf16 %v3273_v36 }
 0x46a   : > { %v2269_v4 = vsel %vm1120_vm7, %v2261_v54, %v3294_v11  ;;  %v2270_v49 = vsel %vm1120_vm7, %v2262_v52, %v3295_v12 }
 0x46b   : > { %v2304_v29 = vpack.c.bf16 %v2270_v49, %v2269_v4  ;;  %v2293_v43 = vsel %vm1120_vm7, %v2285_v22, %v3274_v62  ;;  %v2294_v48 = vsel %vm1120_vm7, %v2286_v19, %v3275_v35  ;;  %v2612_v35 = vld [vmem:[%s4982_s8 + $0x20] sm:$0xff]  ;;  %v2613_v22 = vld [vmem:[%s4982_s8 + $0x28] sm:$0xff] }
 0x46c   : > { %v2305_v51 = vpack.c.bf16 %v2294_v48, %v2293_v43 }
 0x46e   : > { %2526 = vmatprep.mubr.bf16.mxu0 %v2305_v51 }
 0x46f   : > { %2527 = vmatmul.mubr.bf16.gmra.mrb[28].mxu0 %v2304_v29 }
 0x4a6   : > { %v2892_v3 = vpop.f32.mrb[24].mxu1 }
 0x4a7   : > { %v2569_v50 = vpop.f32.mrb[25].mxu1 }
 0x4a8   : > { %v2893_v30 = vpop.f32.mrb[26].mxu1 }
 0x4a9   : > { %v2572_v53 = vpop.f32.mrb[27].mxu1 }
 0x4ae   : > { %v4916_v57 = vpop.f32.mrb[28].mxu1 }
 0x4af   : > { %v2585_v26 = vpop.f32.mrb[29].mxu1 }
 0x4b0   : > { %v4918_v18 = vpop.f32.mrb[30].mxu1 }
 0x4b1   : > { %v2588_v5 = vpop.f32.mrb[31].mxu1 }
 0x528   : > { %v2844_v8 = vpop.f32.mrb[16].mxu0 }
 0x529   : > { %v2845_v23 = vpop.f32.mrb[17].mxu0 }
 0x52a   : > { %v2846_v13 = vadd.f32 %v2845_v23, %v2844_v8  ;;  %v2847_v33 = vpop.f32.mrb[18].mxu0 }
 0x52b   : > { %v2848_v15 = vpop.f32.mrb[19].mxu0 }
 0x52c   : > { %v2505_v16 = vadd.f32 %v2846_v13, %v4923_v41  ;;  %v2849_v55 = vadd.f32 %v2848_v15, %v2847_v33  ;;  %v2614_v13 = vld [vmem:[%s4982_s8 + $0x30] sm:$0xff] }
 0x52e   : > { %v2570_v45 = vadd.f32 %v2569_v50, %v2505_v16  ;;  %v2508_v47 = vadd.f32 %v2849_v55, %v4923_v41  ;;  %v2615_v16 = vld [vmem:[%s4982_s8 + $0x38] sm:$0xff] }
 0x530   : > { %v2600_v14 = vmax.f32 %v2570_v45, 0.0  ;;  %v2573_v60 = vadd.f32 %v2572_v53, %v2508_v47  ;;  %v2850_v28 = vpop.f32.mrb[20].mxu0 }
 0x531   : > { %v2851_v46 = vpop.f32.mrb[21].mxu0 }
 0x532   : > { %v2601_v56 = vmax.f32 %v2573_v60, 0.0  ;;  %v2852_v63 = vadd.f32 %v2851_v46, %v2850_v28  ;;  %v2853_v25 = vpop.f32.mrb[22].mxu0  ;;  %v2616_v34 = vmul.f32 %v2608_v59, %v2600_v14 }
 0x533   : > { %v2854_v37 = vpop.f32.mrb[23].mxu0 }
 0x534   : > { %v2513_v21 = vadd.f32 %v2852_v63, %v4923_v41  ;;  %v2855_v39 = vadd.f32 %v2854_v37, %v2853_v25  ;;  %v2624_v20 = vsel %vm1075_vm2, %v2616_v34, 0.0  ;;  %v2617_v1 = vmul.f32 %v2609_v44, %v2601_v56 }
 0x535   : > { %2625 = vadd.xlane.f32.xlu0 %v2624_v20 }
 0x536   : > { %v2578_v10 = vadd.f32 %v2892_v3, %v2513_v21  ;;  %v2516_v40 = vadd.f32 %v2855_v39, %v4923_v41  ;;  %v2627_v9 = vsel %vm1075_vm2, %v2617_v1, 0.0 }
 0x537   : > { %2628 = vadd.xlane.f32.xlu1 %v2627_v9 }
 0x538   : > { %v2602_v42 = vmax.f32 %v2578_v10, 0.0  ;;  %v2581_v31 = vadd.f32 %v2893_v30, %v2516_v40  ;;  %v2856_v27 = vpop.f32.mrb[24].mxu0 }
 0x539   : > { %v2857_v61 = vpop.f32.mrb[25].mxu0 }
 0x53a   : > { %v2603_v24 = vmax.f32 %v2581_v31, 0.0  ;;  %v2618_v17 = vmul.f32 %v2610_v32, %v2602_v42  ;;  %v2858_v2 = vadd.f32 %v2857_v61, %v2856_v27  ;;  %v2859_v38 = vpop.f32.mrb[26].mxu0  ;;  %v2661_v42 = vld [vmem:[#allocation2] sm:$0x1] }
 0x53b   : > { %v2860_v11 = vpop.f32.mrb[27].mxu0 }
 0x53c   : > { %v2630_v58 = vsel %vm1075_vm2, %v2618_v17, 0.0  ;;  %v2619_v12 = vmul.f32 %v2611_v6, %v2603_v24  ;;  %v2521_v7 = vadd.f32 %v2858_v2, %v4923_v41  ;;  %v2861_v0 = vadd.f32 %v2860_v11, %v2859_v38 }
 0x53d   : > { %2631 = vadd.xlane.f32.xlu0 %v2630_v58 }
 0x53e   : > { %v2586_v52 = vadd.f32 %v2585_v26, %v2521_v7  ;;  %v2524_v54 = vadd.f32 %v2861_v0, %v4923_v41  ;;  %v2633_v36 = vsel %vm1075_vm2, %v2619_v12, 0.0 }
 0x540   : > { %v2604_v62 = vmax.f32 %v2586_v52, 0.0  ;;  %v2589_v4 = vadd.f32 %v2588_v5, %v2524_v54 }
 0x541   : > { %2634 = vadd.xlane.f32.xlu0 %v2633_v36 }
 0x542   : > { %v2862_v49 = vpop.f32.mrb[28].mxu0  ;;  %v2605_v19 = vmax.f32 %v2589_v4, 0.0  ;;  %v2620_v43 = vmul.f32 %v2612_v35, %v2604_v62 }
 0x543   : > { %v2863_v29 = vpop.f32.mrb[29].mxu0 }
 0x544   : > { %v2864_v48 = vadd.f32 %v2863_v29, %v2862_v49  ;;  %v2865_v51 = vpop.f32.mrb[30].mxu0  ;;  %v2636_v50 = vsel %vm1075_vm2, %v2620_v43, 0.0  ;;  %v2621_v30 = vmul.f32 %v2613_v22, %v2605_v19 }
 0x545   : > { %v2866_v3 = vpop.f32.mrb[31].mxu0  ;;  %2637 = vadd.xlane.f32.xlu1 %v2636_v50 }
 0x546   : > { %v2529_v53 = vadd.f32 %v2864_v48, %v4923_v41  ;;  %v2867_v26 = vadd.f32 %v2866_v3, %v2865_v51  ;;  %v2639_v5 = vsel %vm1075_vm2, %v2621_v30, 0.0 }
 0x547   : > { %2640 = vadd.xlane.f32.xlu0 %v2639_v5 }
 0x548   : > { %v2594_v8 = vadd.f32 %v4916_v57, %v2529_v53  ;;  %v2532_v23 = vadd.f32 %v2867_v26, %v4923_v41 }
 0x54a   : > { %v2606_v33 = vmax.f32 %v2594_v8, 0.0  ;;  %v2597_v15 = vadd.f32 %v4918_v18, %v2532_v23 }
 0x54c   : > { %v2607_v55 = vmax.f32 %v2597_v15, 0.0  ;;  %v2622_v45 = vmul.f32 %v2614_v13, %v2606_v33 }
 0x54e   : > { %v2642_v47 = vsel %vm1075_vm2, %v2622_v45, 0.0  ;;  %v2623_v59 = vmul.f32 %v2615_v16, %v2607_v55 }
 0x54f   : > { %2643 = vadd.xlane.f32.xlu1 %v2642_v47 }
 0x550   : > { %v2645_v57 = vsel %vm1075_vm2, %v2623_v59, 0.0 }
 0x551   : > { %2646 = vadd.xlane.f32.xlu0 %v2645_v57 }
 0x5c2   : > { %v2626_v41 = vpop.xlane.xlu0 %2625 }
 0x5c4   : > { %v2629_v60 = vpop.xlane.xlu1 %2628 }
 0x5c5   : > { %v2648_v28 = vadd.f32 %v2629_v60, %v2626_v41 }
 0x5ca   : > { %v2632_v14 = vpop.xlane.xlu0 %2631 }
 0x5cb   : > { %v2649_v44 = vadd.f32 %v2648_v28, %v2632_v14 }
 0x5ce   : > { %v2635_v46 = vpop.xlane.xlu0 %2634 }
 0x5cf   : > { %v2650_v56 = vadd.f32 %v2649_v44, %v2635_v46 }
 0x5d2   : > { %v2638_v18 = vpop.xlane.xlu1 %2637 }
 0x5d3   : > { %v2651_v63 = vadd.f32 %v2650_v56, %v2638_v18 }
 0x5d4   : > { %v2641_v25 = vpop.xlane.xlu0 %2640 }
 0x5d5   : > { %v2652_v34 = vadd.f32 %v2651_v63, %v2641_v25 }
 0x5dc   : > { %v2644_v37 = vpop.xlane.xlu1 %2643 }
 0x5dd   : > { %v2653_v21 = vadd.f32 %v2652_v34, %v2644_v37 }
 0x5de   : > { %v2647_v39 = vpop.xlane.xlu0 %2646 }
 0x5df   : > { %v2654_v20 = vadd.f32 %v2653_v21, %v2647_v39 }
 0x5e1   : > { %v2655_v1 = vrot.slane %v2654_v20, 4 }
 0x5e3   : > { %v2656_v10 = vadd.f32 %v2655_v1, %v2654_v20 }
 0x5e5   : > { %v2657_v40 = vrot.slane %v2656_v10, 2 }
 0x5e7   : > { %v2658_v9 = vadd.f32 %v2657_v40, %v2656_v10 }
 0x5e9   : > { %v2659_v32 = vrot.slane %v2658_v9, 1 }
 0x5eb   : > { %v2660_v31 = vadd.f32 %v2659_v32, %v2658_v9 }
 0x5ed   : > { %v2662_v6 = vadd.f32 %v2661_v42, %v2660_v31 }
 0x5ef   : > { %2664 = vst.msk [vmem:[%s357_s24] sm:$0x1] %vm2663_vm9, %v2662_v6 }
 0x5f0 PF: > { %s22_s15 = sadd.s32 1, %s3347_s15  }
 0x5f1   : > { %p19_p4 = scmp.ge.s32.totalorder %s22_s15, 4  }
 0x5f3   :  { %21 = sbr.rel (!%p19_p4) target bundleno = 3 (0x3), region = 90 }

</bundles_post_ra>
